<compile_context>
chip_gen: v7x
topology: tpu7x:2x2x1
jax: 0.10.0
libtpu: 0.0.40
codegen_flags: <defaults>
</compile_context>

<pallas_src>
import jax
import jax.numpy as jnp
from jax.experimental import pallas as pl
from jax.experimental.pallas import tpu as pltpu

EPS = 1e-5            # nn.BatchNorm2d default
LANE = 128            # TPU lane width


def _round_up(n, m):
    return (n + m - 1) // m * m


def _pick_vmem_limit():
    """Per-generation VMEM budget (v5e/v6e: 128 MiB physical, v7x: 64 MiB)."""
    try:
        cap = pltpu.get_tpu_info().vmem_capacity_bytes
    except Exception:
        cap = 64 * 1024 * 1024
    return int(min(cap * 3 // 4, 100 * 1024 * 1024))


VMEM_LIMIT = _pick_vmem_limit()


def _cparams():
    return pltpu.CompilerParams(dimension_semantics=("parallel",),
                                vmem_limit_bytes=VMEM_LIMIT)


# ----------------------------- Pallas kernels ------------------------------ #

def make_conv_stats_kernel(s, hh, ho, wo, with_shortcut):
    """Implicit-GEMM 3x3 conv (pad=1, stride=s) over one phase-folded image.

    Input layout: (1, s*s*hh, wh, Cinp) where phase p = (dy%s)*s + (dx%s) lives
    at rows [p*hh, (p+1)*hh).  Tap (dy,dx) of output (i,j) reads phase-row
    i + dy//s, phase-col j + dx//s.  Optionally fuses the 1x1/stride-s
    projection shortcut (== centre tap) and emits per-image BN partial stats.
    """
    r = ho * wo

    def kernel(x_ref, w_ref, *rest):
        if with_shortcut:
            ws_ref, y_ref, s_ref, q_ref, ys_ref, ss_ref, qs_ref = rest
        else:
            y_ref, s_ref, q_ref = rest

        def tap_lhs(dy, dx):
            p = (dy % s) * s + (dx % s)
            row0 = p * hh + dy // s
            col0 = dx // s
            xw = x_ref[0, row0:row0 + ho, col0:col0 + wo, :]   # (ho, wo, Cinp)
            return xw.reshape(r, xw.shape[-1])

        acc = jnp.zeros((r, w_ref.shape[-1]), jnp.float32)
        for t in range(9):                       # static 9-tap unroll
            dy, dx = divmod(t, 3)
            acc = acc + jnp.dot(tap_lhs(dy, dx), w_ref[t],
                                preferred_element_type=jnp.float32)

        y_ref[0] = acc.astype(y_ref.dtype)       # bf16 store of the GEMM output
        s_ref[0] = jnp.sum(acc, axis=0, keepdims=True)          # f32 stats
        q_ref[0] = jnp.sum(acc * acc, axis=0, keepdims=True)

        if with_shortcut:
            # 1x1 stride-s conv == centre tap of the 3x3 window.
            xc = tap_lhs(1, 1)
            ysv = jnp.dot(xc, ws_ref[...], preferred_element_type=jnp.float32)
            ys_ref[0] = ysv.astype(ys_ref.dtype)
            ss_ref[0] = jnp.sum(ysv, axis=0, keepdims=True)
            qs_ref[0] = jnp.sum(ysv * ysv, axis=0, keepdims=True)

    return kernel


def make_bn_relu_kernel(ho, wo):
    """h = relu(y * scale + shift) in f32, stored as bf16 NHWC (one image)."""
    def kernel(y_ref, a_ref, b_ref, o_ref):
        hv = jnp.maximum(y_ref[0].astype(jnp.float32) * a_ref[...] + b_ref[...], 0.0)
        o_ref[0] = hv.reshape(ho, wo, hv.shape[-1]).astype(o_ref.dtype)
    return kernel


def make_tail_proj_kernel(ho, wo):
    """out = relu(BN2(conv2) + BNs(conv1x1)), f32 epilogue, NHWC output."""
    def kernel(y2_ref, ys_ref, a2_ref, b2_ref, as_ref, bs_ref, o_ref):
        left = y2_ref[0].astype(jnp.float32) * a2_ref[...] + b2_ref[...]
        sc = ys_ref[0].astype(jnp.float32) * as_ref[...] + bs_ref[...]
        out = jnp.maximum(left + sc, 0.0)
        o_ref[0] = out.reshape(ho, wo, out.shape[-1])
    return kernel


def make_tail_id_kernel(ho, wo):
    """out = relu(BN2(conv2) + identity), identity read from the padded input."""
    r = ho * wo

    def kernel(y2_ref, x_ref, a2_ref, b2_ref, o_ref):
        left = y2_ref[0].astype(jnp.float32) * a2_ref[...] + b2_ref[...]
        xi = x_ref[0, 1:1 + ho, 1:1 + wo, :].astype(jnp.float32).reshape(r, left.shape[-1])
        out = jnp.maximum(left + xi, 0.0)
        o_ref[0] = out.reshape(ho, wo, out.shape[-1])
    return kernel


# ------------------------------ pallas_call wrappers ------------------------ #

def conv_stats(x_ph, w_taps, ws_mat, *, s, hh, ho, wo):
    """Per-image implicit-GEMM conv + BN partial stats (+ fused 1x1 shortcut)."""
    n, ph, ww, cinp = x_ph.shape
    coutp = w_taps.shape[-1]
    assert ph == s * s * hh
    r = ho * wo
    with_sc = ws_mat is not None
    kernel = make_conv_stats_kernel(s, hh, ho, wo, with_sc)

    y_shape = jax.ShapeDtypeStruct((n, r, coutp), jnp.bfloat16)
    st_shape = jax.ShapeDtypeStruct((n, 1, coutp), jnp.float32)
    y_spec = pl.BlockSpec((1, r, coutp), lambda i: (i, 0, 0))
    st_spec = pl.BlockSpec((1, 1, coutp), lambda i: (i, 0, 0))

    out_shape = (y_shape, st_shape, st_shape)
    out_specs = (y_spec, st_spec, st_spec)
    in_specs = [pl.BlockSpec((1, ph, ww, cinp), lambda i: (i, 0, 0, 0)),
                pl.BlockSpec((9, cinp, coutp), lambda i: (0, 0, 0))]
    args = [x_ph, w_taps]
    if with_sc:
        in_specs.append(pl.BlockSpec((cinp, coutp), lambda i: (0, 0)))
        args.append(ws_mat)
        out_shape = out_shape + (y_shape, st_shape, st_shape)
        out_specs = out_specs + (y_spec, st_spec, st_spec)

    return pl.pallas_call(
        kernel,
        out_shape=out_shape,
        grid=(n,),
        in_specs=in_specs,
        out_specs=out_specs,
        compiler_params=_cparams(),
    )(*args)


def bn_relu(y, scale, shift, ho, wo):
    n, r, cp = y.shape
    return pl.pallas_call(
        make_bn_relu_kernel(ho, wo),
        out_shape=jax.ShapeDtypeStruct((n, ho, wo, cp), jnp.bfloat16),
        grid=(n,),
        in_specs=[pl.BlockSpec((1, r, cp), lambda i: (i, 0, 0)),
                  pl.BlockSpec((1, cp), lambda i: (0, 0)),
                  pl.BlockSpec((1, cp), lambda i: (0, 0))],
        out_specs=pl.BlockSpec((1, ho, wo, cp), lambda i: (i, 0, 0, 0)),
        compiler_params=_cparams(),
    )(y, scale, shift)


def tail_proj(y2, ys, a2, b2, a_s, b_s, ho, wo):
    n, r, cp = y2.shape
    return pl.pallas_call(
        make_tail_proj_kernel(ho, wo),
        out_shape=jax.ShapeDtypeStruct((n, ho, wo, cp), jnp.float32),
        grid=(n,),
        in_specs=[pl.BlockSpec((1, r, cp), lambda i: (i, 0, 0)),
                  pl.BlockSpec((1, r, cp), lambda i: (i, 0, 0)),
                  pl.BlockSpec((1, cp), lambda i: (0, 0)),
                  pl.BlockSpec((1, cp), lambda i: (0, 0)),
                  pl.BlockSpec((1, cp), lambda i: (0, 0)),
                  pl.BlockSpec((1, cp), lambda i: (0, 0))],
        out_specs=pl.BlockSpec((1, ho, wo, cp), lambda i: (i, 0, 0, 0)),
        compiler_params=_cparams(),
    )(y2, ys, a2, b2, a_s, b_s)


def tail_id(y2, xp, a2, b2, ho, wo):
    n, r, cp = y2.shape
    hp, wp = xp.shape[1], xp.shape[2]
    return pl.pallas_call(
        make_tail_id_kernel(ho, wo),
        out_shape=jax.ShapeDtypeStruct((n, ho, wo, cp), jnp.float32),
        grid=(n,),
        in_specs=[pl.BlockSpec((1, r, cp), lambda i: (i, 0, 0)),
                  pl.BlockSpec((1, hp, wp, cp), lambda i: (i, 0, 0, 0)),
                  pl.BlockSpec((1, cp), lambda i: (0, 0)),
                  pl.BlockSpec((1, cp), lambda i: (0, 0))],
        out_specs=pl.BlockSpec((1, ho, wo, cp), lambda i: (i, 0, 0, 0)),
        compiler_params=_cparams(),
    )(y2, xp, a2, b2)


# --------------------------------- Glue ------------------------------------ #

def _out_geom(hin, s):
    """(Ho, Hh, Hp) for a 3x3 / pad=1 / stride=s conv with phase folding."""
    ho = (hin + 2 - 3) // s + 1
    rmax = 2 // s                               # max(dy // s) over dy in {0,1,2}
    hh = max(ho + rmax, -(-(hin + 2) // s))     # per-phase rows
    return ho, hh, s * hh                       # padded rows = s * hh


def _fold_phases(xp, s, hh, wh):
    """Space-to-depth phase fold: (N, s*hh, s*wh, C) -> (N, s*s*hh, wh, C)."""
    if s == 1:
        return xp
    n, _, _, c = xp.shape
    x6 = xp.reshape(n, hh, s, wh, s, c)
    x6 = jnp.transpose(x6, (0, 2, 4, 1, 3, 5))   # (N, s, s, hh, wh, C)
    return x6.reshape(n, s * s * hh, wh, c)


def conv3x3_taps(w, cinp, coutp):
    """OIHW (Cout,Cin,3,3) -> (9, cinp, coutp) bf16, tap index = kh*3 + kw."""
    cout, cin, kh, kw = w.shape
    m = jnp.transpose(w, (2, 3, 1, 0)).reshape(kh * kw, cin, cout)
    m = jnp.pad(m, ((0, 0), (0, cinp - cin), (0, coutp - cout)))
    return m.astype(jnp.bfloat16)


def conv1x1_mat(w, cinp, coutp):
    """OIHW (Cout,Cin,1,1) -> (cinp, coutp) bf16."""
    cout, cin = w.shape[0], w.shape[1]
    m = jnp.transpose(w[:, :, 0, 0], (1, 0))
    m = jnp.pad(m, ((0, cinp - cin), (0, coutp - cout)))
    return m.astype(jnp.bfloat16)


def scale_shift(s_part, q_part, gamma, beta, n_rows, cp):
    """Combine per-image partial sums into BN scale/shift: BN(y) == y*a + b."""
    tot = jnp.sum(s_part, axis=(0, 1))
    tot2 = jnp.sum(q_part, axis=(0, 1))
    mean = tot / n_rows
    var = jnp.maximum(tot2 / n_rows - mean * mean, 0.0)     # biased, train-mode
    g = jnp.pad(gamma, (0, cp - gamma.shape[0]))
    b = jnp.pad(beta, (0, cp - beta.shape[0]))
    a = g * jax.lax.rsqrt(var + EPS)
    return a.reshape(1, cp), (b - mean * a).reshape(1, cp)


def init_params(key, inchannel, outchannel, stride):
    ks = jax.random.split(key, 9)
    p = {
        "stride": stride,
        "has_shortcut": (stride != 1 or inchannel != outchannel),
        "w1": 0.1 * jax.random.normal(ks[0], (outchannel, inchannel, 3, 3), jnp.float32),
        "g1": 1.0 + 0.1 * jax.random.normal(ks[1], (outchannel,), jnp.float32),
        "b1": 0.1 * jax.random.normal(ks[2], (outchannel,), jnp.float32),
        "w2": 0.1 * jax.random.normal(ks[3], (outchannel, outchannel, 3, 3), jnp.float32),
        "g2": 1.0 + 0.1 * jax.random.normal(ks[4], (outchannel,), jnp.float32),
        "b2": 0.1 * jax.random.normal(ks[5], (outchannel,), jnp.float32),
    }
    if p["has_shortcut"]:
        p["ws"] = 0.1 * jax.random.normal(ks[6], (outchannel, inchannel, 1, 1), jnp.float32)
        p["gs"] = 1.0 + 0.1 * jax.random.normal(ks[7], (outchannel,), jnp.float32)
        p["bs"] = 0.1 * jax.random.normal(ks[8], (outchannel,), jnp.float32)
    return p


def residual_block_forward(params, x):
    """Pallas forward. x: (N, Cin, H, W) f32 -> (N, Cout, Ho, Wo) f32."""
    n, cin, h, w = x.shape
    cout = params["w1"].shape[0]
    s = params["stride"]
    cinp = _round_up(cin, LANE)
    cp = _round_up(cout, LANE)

    x_nhwc = jnp.transpose(x, (0, 2, 3, 1))            # API-boundary transpose only

    ho, hh, hp = _out_geom(h, s)
    wo, wh, wp = _out_geom(w, s)
    rows = n * ho * wo

    # Pad (spatial conv pad + lane pad) and cast once, then phase-fold (s>1 only).
    xp = jnp.pad(x_nhwc.astype(jnp.bfloat16),
                 ((0, 0), (1, hp - h - 1), (1, wp - w - 1), (0, cinp - cin)))
    x_ph = _fold_phases(xp, s, hh, wh)

    # ---- conv1 (3x3, stride s) [+ fused 1x1 shortcut] + per-image BN stats ----
    w1t = conv3x3_taps(params["w1"], cinp, cp)
    if params["has_shortcut"]:
        wsm = conv1x1_mat(params["ws"], cinp, cp)
        y1, s1, q1, ys, ss, qs = conv_stats(x_ph, w1t, wsm, s=s, hh=hh, ho=ho, wo=wo)
    else:
        y1, s1, q1 = conv_stats(x_ph, w1t, None, s=s, hh=hh, ho=ho, wo=wo)

    a1, b1 = scale_shift(s1, q1, params["g1"], params["b1"], rows, cp)
    h1 = bn_relu(y1, a1, b1, ho, wo)                   # (N, Ho, Wo, Cp) bf16

    # ---- conv2 (3x3, stride 1) + per-image BN stats ----
    # TODO(synk): write this padded layout directly from bn_relu to drop the pad pass.
    h1p = jnp.pad(h1, ((0, 0), (1, 1), (1, 1), (0, 0)))
    w2t = conv3x3_taps(params["w2"], cp, cp)
    y2, s2, q2 = conv_stats(h1p, w2t, None, s=1, hh=ho + 2, ho=ho, wo=wo)
    a2, b2 = scale_shift(s2, q2, params["g2"], params["b2"], rows, cp)

    # ---- residual add + ReLU ----
    if params["has_shortcut"]:
        a_s, b_s = scale_shift(ss, qs, params["gs"], params["bs"], rows, cp)
        o = tail_proj(y2, ys, a2, b2, a_s, b_s, ho, wo)
    else:
        # identity shortcut read from the interior of the already-padded input
        o = tail_id(y2, xp, a2, b2, ho, wo)

    out = o[:, :, :, :cout]                            # drop lane padding
    return jnp.transpose(out, (0, 3, 1, 2))            # back to NCHW


# ------------------------------- Reference --------------------------------- #

def reference_forward(params, x):
    def conv(x, w, s, pad):
        return jax.lax.conv_general_dilated(
            x, w, (s, s), [(pad, pad), (pad, pad)],
            dimension_numbers=("NCHW", "OIHW", "NCHW"),
            precision=jax.lax.Precision.HIGHEST)

    def bn(y, g, b):
        mean = y.mean(axis=(0, 2, 3), keepdims=True)
        var = ((y - mean) ** 2).mean(axis=(0, 2, 3), keepdims=True)
        return (y - mean) * jax.lax.rsqrt(var + EPS) * g.reshape(1, -1, 1, 1) + b.reshape(1, -1, 1, 1)

    s = params["stride"]
    h = jnp.maximum(bn(conv(x, params["w1"], s, 1), params["g1"], params["b1"]), 0.0)
    left = bn(conv(h, params["w2"], 1, 1), params["g2"], params["b2"])
    if params["has_shortcut"]:
        short = bn(conv(x, params["ws"], s, 0), params["gs"], params["bs"])
    else:
        short = x
    return jnp.maximum(left + short, 0.0)


# ---------------------------------- Main ------------------------------------ #

if __name__ == "__main__":
    key = jax.random.PRNGKey(0)
    kx, kp1, kp2, kx3, kp3 = jax.random.split(key, 5)

    # bf16-in / f32-acc MXU matmuls + bf16 intermediates vs HIGHEST f32 reference.
    ATOL = RTOL = 5e-2

    # Case 1: projection shortcut (channel change + stride 2) -> fused 1x1 path.
    x1 = jax.random.normal(kx, (2, 4, 16, 16), jnp.float32)
    params1 = init_params(kp1, inchannel=4, outchannel=8, stride=2)
    y1 = jax.block_until_ready(residual_block_forward(params1, x1))
    r1 = reference_forward(params1, x1)
    assert y1.shape == (2, 8, 8, 8), y1.shape
    assert jnp.allclose(y1, r1, atol=ATOL, rtol=RTOL), float(jnp.max(jnp.abs(y1 - r1)))

    # Case 2: identity shortcut (inchannel == outchannel, stride == 1).
    x2 = jax.random.normal(kx, (2, 4, 16, 16), jnp.float32)
    params2 = init_params(kp2, inchannel=4, outchannel=4, stride=1)
    y2 = jax.block_until_ready(residual_block_forward(params2, x2))
    r2 = reference_forward(params2, x2)
    assert y2.shape == (2, 4, 16, 16), y2.shape
    assert jnp.allclose(y2, r2, atol=ATOL, rtol=RTOL), float(jnp.max(jnp.abs(y2 - r2)))

    # Case 3: projection shortcut with stride 1 (channel change only); exercises
    # the cross-image partial-stat reduction and the fused shortcut at s=1.
    x3 = jax.random.normal(kx3, (2, 8, 24, 24), jnp.float32)
    params3 = init_params(kp3, inchannel=8, outchannel=16, stride=1)
    y3 = jax.block_until_ready(residual_block_forward(params3, x3))
    r3 = reference_forward(params3, x3)
    assert y3.shape == (2, 16, 24, 24), y3.shape
    assert jnp.allclose(y3, r3, atol=ATOL, rtol=RTOL), float(jnp.max(jnp.abs(y3 - r3)))

    print("KERNEL_OK")
</pallas_src>

<mosaic_0001>
module attributes {stable_mosaic.version = 11 : i64} {
  func.func @kernel(%arg0: i32, %arg1: memref<1x36x9x128xbf16, #tpu.memory_space<vmem>>, %arg2: memref<9x128x128xbf16, #tpu.memory_space<vmem>>, %arg3: memref<128x128xbf16, #tpu.memory_space<vmem>>, %arg4: memref<1x64x128xbf16, #tpu.memory_space<vmem>>, %arg5: memref<1x1x128xf32, #tpu.memory_space<vmem>>, %arg6: memref<1x1x128xf32, #tpu.memory_space<vmem>>, %arg7: memref<1x64x128xbf16, #tpu.memory_space<vmem>>, %arg8: memref<1x1x128xf32, #tpu.memory_space<vmem>>, %arg9: memref<1x1x128xf32, #tpu.memory_space<vmem>>) attributes {dimension_semantics = [#tpu.dimension_semantics<parallel>], iteration_bounds = array<i64: 2>, scalar_prefetch = 0 : i64, scratch_operands = 0 : i64, tpu.core_type = #tpu.core_type<tc>, window_params = [{transform_indices = @transform_0, window_bounds = array<i64: 1, 36, 9, 128>}, {pipeline_mode = #tpu.pipeline_mode<synchronous>, transform_indices = @transform_1, window_bounds = array<i64: 9, 128, 128>}, {pipeline_mode = #tpu.pipeline_mode<synchronous>, transform_indices = @transform_2, window_bounds = array<i64: 128, 128>}, {transform_indices = @transform_3, window_bounds = array<i64: 1, 64, 128>}, {transform_indices = @transform_4, window_bounds = array<i64: 1, 1, 128>}, {transform_indices = @transform_5, window_bounds = array<i64: 1, 1, 128>}, {transform_indices = @transform_6, window_bounds = array<i64: 1, 64, 128>}, {transform_indices = @transform_7, window_bounds = array<i64: 1, 1, 128>}, {transform_indices = @transform_8, window_bounds = array<i64: 1, 1, 128>}]} {
    %cst = arith.constant 0.000000e+00 : f32
    %0 = vector.broadcast %cst : f32 to vector<64x128xf32>
    %c0 = arith.constant 0 : index
    %c0_0 = arith.constant 0 : index
    %c0_1 = arith.constant 0 : index
    %c0_2 = arith.constant 0 : index
    %1 = vector.load %arg1[%c0, %c0_0, %c0_1, %c0_2] : memref<1x36x9x128xbf16, #tpu.memory_space<vmem>>, vector<1x8x8x128xbf16>
    %2 = vector.shape_cast %1 : vector<1x8x8x128xbf16> to vector<8x8x128xbf16>
    %3 = vector.shape_cast %2 : vector<8x8x128xbf16> to vector<64x128xbf16>
    %c0_3 = arith.constant 0 : index
    %c0_4 = arith.constant 0 : index
    %c0_5 = arith.constant 0 : index
    %4 = vector.load %arg2[%c0_3, %c0_4, %c0_5] : memref<9x128x128xbf16, #tpu.memory_space<vmem>>, vector<1x128x128xbf16>
    %5 = vector.shape_cast %4 : vector<1x128x128xbf16> to vector<128x128xbf16>
    %cst_6 = arith.constant dense<0.000000e+00> : vector<64x128xf32>
    %6 = tpu.matmul %3, %5, %cst_6 {dimension_numbers = #tpu.dot_dimension_numbers<[1], [0], [0], [1], [0, 0, 1, 1], [], []>} : vector<64x128xbf16>, vector<128x128xbf16>, vector<64x128xf32> -> vector<64x128xf32>
    %7 = arith.addf %0, %6 : vector<64x128xf32>
    %c0_7 = arith.constant 0 : index
    %c9 = arith.constant 9 : index
    %c0_8 = arith.constant 0 : index
    %c0_9 = arith.constant 0 : index
    %8 = vector.load %arg1[%c0_7, %c9, %c0_8, %c0_9] : memref<1x36x9x128xbf16, #tpu.memory_space<vmem>>, vector<1x8x8x128xbf16>
    %9 = vector.shape_cast %8 : vector<1x8x8x128xbf16> to vector<8x8x128xbf16>
    %10 = vector.shape_cast %9 : vector<8x8x128xbf16> to vector<64x128xbf16>
    %c1 = arith.constant 1 : index
    %c0_10 = arith.constant 0 : index
    %c0_11 = arith.constant 0 : index
    %11 = vector.load %arg2[%c1, %c0_10, %c0_11] : memref<9x128x128xbf16, #tpu.memory_space<vmem>>, vector<1x128x128xbf16>
    %12 = vector.shape_cast %11 : vector<1x128x128xbf16> to vector<128x128xbf16>
    %cst_12 = arith.constant dense<0.000000e+00> : vector<64x128xf32>
    %13 = tpu.matmul %10, %12, %cst_12 {dimension_numbers = #tpu.dot_dimension_numbers<[1], [0], [0], [1], [0, 0, 1, 1], [], []>} : vector<64x128xbf16>, vector<128x128xbf16>, vector<64x128xf32> -> vector<64x128xf32>
    %14 = arith.addf %7, %13 : vector<64x128xf32>
    %c0_13 = arith.constant 0 : index
    %c0_14 = arith.constant 0 : index
    %c1_15 = arith.constant 1 : index
    %c0_16 = arith.constant 0 : index
    %15 = vector.load %arg1[%c0_13, %c0_14, %c1_15, %c0_16] : memref<1x36x9x128xbf16, #tpu.memory_space<vmem>>, vector<1x8x8x128xbf16>
    %16 = vector.shape_cast %15 : vector<1x8x8x128xbf16> to vector<8x8x128xbf16>
    %17 = vector.shape_cast %16 : vector<8x8x128xbf16> to vector<64x128xbf16>
    %c2 = arith.constant 2 : index
    %c0_17 = arith.constant 0 : index
    %c0_18 = arith.constant 0 : index
    %18 = vector.load %arg2[%c2, %c0_17, %c0_18] : memref<9x128x128xbf16, #tpu.memory_space<vmem>>, vector<1x128x128xbf16>
    %19 = vector.shape_cast %18 : vector<1x128x128xbf16> to vector<128x128xbf16>
    %cst_19 = arith.constant dense<0.000000e+00> : vector<64x128xf32>
    %20 = tpu.matmul %17, %19, %cst_19 {dimension_numbers = #tpu.dot_dimension_numbers<[1], [0], [0], [1], [0, 0, 1, 1], [], []>} : vector<64x128xbf16>, vector<128x128xbf16>, vector<64x128xf32> -> vector<64x128xf32>
    %21 = arith.addf %14, %20 : vector<64x128xf32>
    %c0_20 = arith.constant 0 : index
    %c18 = arith.constant 18 : index
    %c0_21 = arith.constant 0 : index
    %c0_22 = arith.constant 0 : index
    %22 = vector.load %arg1[%c0_20, %c18, %c0_21, %c0_22] : memref<1x36x9x128xbf16, #tpu.memory_space<vmem>>, vector<1x8x8x128xbf16>
    %23 = vector.shape_cast %22 : vector<1x8x8x128xbf16> to vector<8x8x128xbf16>
    %24 = vector.shape_cast %23 : vector<8x8x128xbf16> to vector<64x128xbf16>
    %c3 = arith.constant 3 : index
    %c0_23 = arith.constant 0 : index
    %c0_24 = arith.constant 0 : index
    %25 = vector.load %arg2[%c3, %c0_23, %c0_24] : memref<9x128x128xbf16, #tpu.memory_space<vmem>>, vector<1x128x128xbf16>
    %26 = vector.shape_cast %25 : vector<1x128x128xbf16> to vector<128x128xbf16>
    %cst_25 = arith.constant dense<0.000000e+00> : vector<64x128xf32>
    %27 = tpu.matmul %24, %26, %cst_25 {dimension_numbers = #tpu.dot_dimension_numbers<[1], [0], [0], [1], [0, 0, 1, 1], [], []>} : vector<64x128xbf16>, vector<128x128xbf16>, vector<64x128xf32> -> vector<64x128xf32>
    %28 = arith.addf %21, %27 : vector<64x128xf32>
    %c0_26 = arith.constant 0 : index
    %c27 = arith.constant 27 : index
    %c0_27 = arith.constant 0 : index
    %c0_28 = arith.constant 0 : index
    %29 = vector.load %arg1[%c0_26, %c27, %c0_27, %c0_28] : memref<1x36x9x128xbf16, #tpu.memory_space<vmem>>, vector<1x8x8x128xbf16>
    %30 = vector.shape_cast %29 : vector<1x8x8x128xbf16> to vector<8x8x128xbf16>
    %31 = vector.shape_cast %30 : vector<8x8x128xbf16> to vector<64x128xbf16>
    %c4 = arith.constant 4 : index
    %c0_29 = arith.constant 0 : index
    %c0_30 = arith.constant 0 : index
    %32 = vector.load %arg2[%c4, %c0_29, %c0_30] : memref<9x128x128xbf16, #tpu.memory_space<vmem>>, vector<1x128x128xbf16>
    %33 = vector.shape_cast %32 : vector<1x128x128xbf16> to vector<128x128xbf16>
    %cst_31 = arith.constant dense<0.000000e+00> : vector<64x128xf32>
    %34 = tpu.matmul %31, %33, %cst_31 {dimension_numbers = #tpu.dot_dimension_numbers<[1], [0], [0], [1], [0, 0, 1, 1], [], []>} : vector<64x128xbf16>, vector<128x128xbf16>, vector<64x128xf32> -> vector<64x128xf32>
    %35 = arith.addf %28, %34 : vector<64x128xf32>
    %c0_32 = arith.constant 0 : index
    %c18_33 = arith.constant 18 : index
    %c1_34 = arith.constant 1 : index
    %c0_35 = arith.constant 0 : index
    %36 = vector.load %arg1[%c0_32, %c18_33, %c1_34, %c0_35] : memref<1x36x9x128xbf16, #tpu.memory_space<vmem>>, vector<1x8x8x128xbf16>
    %37 = vector.shape_cast %36 : vector<1x8x8x128xbf16> to vector<8x8x128xbf16>
    %38 = vector.shape_cast %37 : vector<8x8x128xbf16> to vector<64x128xbf16>
    %c5 = arith.constant 5 : index
    %c0_36 = arith.constant 0 : index
    %c0_37 = arith.constant 0 : index
    %39 = vector.load %arg2[%c5, %c0_36, %c0_37] : memref<9x128x128xbf16, #tpu.memory_space<vmem>>, vector<1x128x128xbf16>
    %40 = vector.shape_cast %39 : vector<1x128x128xbf16> to vector<128x128xbf16>
    %cst_38 = arith.constant dense<0.000000e+00> : vector<64x128xf32>
    %41 = tpu.matmul %38, %40, %cst_38 {dimension_numbers = #tpu.dot_dimension_numbers<[1], [0], [0], [1], [0, 0, 1, 1], [], []>} : vector<64x128xbf16>, vector<128x128xbf16>, vector<64x128xf32> -> vector<64x128xf32>
    %42 = arith.addf %35, %41 : vector<64x128xf32>
    %c0_39 = arith.constant 0 : index
    %c1_40 = arith.constant 1 : index
    %c0_41 = arith.constant 0 : index
    %c0_42 = arith.constant 0 : index
    %43 = vector.load %arg1[%c0_39, %c1_40, %c0_41, %c0_42] : memref<1x36x9x128xbf16, #tpu.memory_space<vmem>>, vector<1x8x8x128xbf16>
    %44 = vector.shape_cast %43 : vector<1x8x8x128xbf16> to vector<8x8x128xbf16>
    %45 = vector.shape_cast %44 : vector<8x8x128xbf16> to vector<64x128xbf16>
    %c6 = arith.constant 6 : index
    %c0_43 = arith.constant 0 : index
    %c0_44 = arith.constant 0 : index
    %46 = vector.load %arg2[%c6, %c0_43, %c0_44] : memref<9x128x128xbf16, #tpu.memory_space<vmem>>, vector<1x128x128xbf16>
    %47 = vector.shape_cast %46 : vector<1x128x128xbf16> to vector<128x128xbf16>
    %cst_45 = arith.constant dense<0.000000e+00> : vector<64x128xf32>
    %48 = tpu.matmul %45, %47, %cst_45 {dimension_numbers = #tpu.dot_dimension_numbers<[1], [0], [0], [1], [0, 0, 1, 1], [], []>} : vector<64x128xbf16>, vector<128x128xbf16>, vector<64x128xf32> -> vector<64x128xf32>
    %49 = arith.addf %42, %48 : vector<64x128xf32>
    %c0_46 = arith.constant 0 : index
    %c10 = arith.constant 10 : index
    %c0_47 = arith.constant 0 : index
    %c0_48 = arith.constant 0 : index
    %50 = vector.load %arg1[%c0_46, %c10, %c0_47, %c0_48] : memref<1x36x9x128xbf16, #tpu.memory_space<vmem>>, vector<1x8x8x128xbf16>
    %51 = vector.shape_cast %50 : vector<1x8x8x128xbf16> to vector<8x8x128xbf16>
    %52 = vector.shape_cast %51 : vector<8x8x128xbf16> to vector<64x128xbf16>
    %c7 = arith.constant 7 : index
    %c0_49 = arith.constant 0 : index
    %c0_50 = arith.constant 0 : index
    %53 = vector.load %arg2[%c7, %c0_49, %c0_50] : memref<9x128x128xbf16, #tpu.memory_space<vmem>>, vector<1x128x128xbf16>
    %54 = vector.shape_cast %53 : vector<1x128x128xbf16> to vector<128x128xbf16>
    %cst_51 = arith.constant dense<0.000000e+00> : vector<64x128xf32>
    %55 = tpu.matmul %52, %54, %cst_51 {dimension_numbers = #tpu.dot_dimension_numbers<[1], [0], [0], [1], [0, 0, 1, 1], [], []>} : vector<64x128xbf16>, vector<128x128xbf16>, vector<64x128xf32> -> vector<64x128xf32>
    %56 = arith.addf %49, %55 : vector<64x128xf32>
    %c0_52 = arith.constant 0 : index
    %c1_53 = arith.constant 1 : index
    %c1_54 = arith.constant 1 : index
    %c0_55 = arith.constant 0 : index
    %57 = vector.load %arg1[%c0_52, %c1_53, %c1_54, %c0_55] : memref<1x36x9x128xbf16, #tpu.memory_space<vmem>>, vector<1x8x8x128xbf16>
    %58 = vector.shape_cast %57 : vector<1x8x8x128xbf16> to vector<8x8x128xbf16>
    %59 = vector.shape_cast %58 : vector<8x8x128xbf16> to vector<64x128xbf16>
    %c8 = arith.constant 8 : index
    %c0_56 = arith.constant 0 : index
    %c0_57 = arith.constant 0 : index
    %60 = vector.load %arg2[%c8, %c0_56, %c0_57] : memref<9x128x128xbf16, #tpu.memory_space<vmem>>, vector<1x128x128xbf16>
    %61 = vector.shape_cast %60 : vector<1x128x128xbf16> to vector<128x128xbf16>
    %cst_58 = arith.constant dense<0.000000e+00> : vector<64x128xf32>
    %62 = tpu.matmul %59, %61, %cst_58 {dimension_numbers = #tpu.dot_dimension_numbers<[1], [0], [0], [1], [0, 0, 1, 1], [], []>} : vector<64x128xbf16>, vector<128x128xbf16>, vector<64x128xf32> -> vector<64x128xf32>
    %63 = arith.addf %56, %62 : vector<64x128xf32>
    %64 = arith.truncf %63 : vector<64x128xf32> to vector<64x128xbf16>
    %c0_59 = arith.constant 0 : index
    %c0_60 = arith.constant 0 : index
    %c0_61 = arith.constant 0 : index
    %65 = vector.load %arg4[%c0_59, %c0_60, %c0_61] : memref<1x64x128xbf16, #tpu.memory_space<vmem>>, vector<1x64x128xbf16>
    %66 = vector.shape_cast %65 : vector<1x64x128xbf16> to vector<64x128xbf16>
    %67 = vector.shape_cast %64 : vector<64x128xbf16> to vector<1x64x128xbf16>
    tpu.vector_store %arg4[%c0_59, %c0_60, %c0_61], %67 {strides = array<i32>} : memref<1x64x128xbf16, #tpu.memory_space<vmem>>, vector<1x64x128xbf16>,
    %cst_62 = arith.constant dense<0.000000e+00> : vector<128xf32>
    %68 = vector.multi_reduction <add>, %63, %cst_62 [0] : vector<64x128xf32> to vector<128xf32>
    %69 = vector.shape_cast %68 : vector<128xf32> to vector<1x128xf32>
    %c0_63 = arith.constant 0 : index
    %c0_64 = arith.constant 0 : index
    %c0_65 = arith.constant 0 : index
    %70 = vector.load %arg5[%c0_63, %c0_64, %c0_65] : memref<1x1x128xf32, #tpu.memory_space<vmem>>, vector<1x1x128xf32>
    %71 = vector.shape_cast %70 : vector<1x1x128xf32> to vector<1x128xf32>
    %72 = vector.shape_cast %69 : vector<1x128xf32> to vector<1x1x128xf32>
    tpu.vector_store %arg5[%c0_63, %c0_64, %c0_65], %72 {strides = array<i32>} : memref<1x1x128xf32, #tpu.memory_space<vmem>>, vector<1x1x128xf32>,
    %73 = arith.mulf %63, %63 : vector<64x128xf32>
    %cst_66 = arith.constant dense<0.000000e+00> : vector<128xf32>
    %74 = vector.multi_reduction <add>, %73, %cst_66 [0] : vector<64x128xf32> to vector<128xf32>
    %75 = vector.shape_cast %74 : vector<128xf32> to vector<1x128xf32>
    %c0_67 = arith.constant 0 : index
    %c0_68 = arith.constant 0 : index
    %c0_69 = arith.constant 0 : index
    %76 = vector.load %arg6[%c0_67, %c0_68, %c0_69] : memref<1x1x128xf32, #tpu.memory_space<vmem>>, vector<1x1x128xf32>
    %77 = vector.shape_cast %76 : vector<1x1x128xf32> to vector<1x128xf32>
    %78 = vector.shape_cast %75 : vector<1x128xf32> to vector<1x1x128xf32>
    tpu.vector_store %arg6[%c0_67, %c0_68, %c0_69], %78 {strides = array<i32>} : memref<1x1x128xf32, #tpu.memory_space<vmem>>, vector<1x1x128xf32>,
    %c0_70 = arith.constant 0 : index
    %c27_71 = arith.constant 27 : index
    %c0_72 = arith.constant 0 : index
    %c0_73 = arith.constant 0 : index
    %79 = vector.load %arg1[%c0_70, %c27_71, %c0_72, %c0_73] : memref<1x36x9x128xbf16, #tpu.memory_space<vmem>>, vector<1x8x8x128xbf16>
    %80 = vector.shape_cast %79 : vector<1x8x8x128xbf16> to vector<8x8x128xbf16>
    %81 = vector.shape_cast %80 : vector<8x8x128xbf16> to vector<64x128xbf16>
    %c0_74 = arith.constant 0 : index
    %c0_75 = arith.constant 0 : index
    %82 = vector.load %arg3[%c0_74, %c0_75] : memref<128x128xbf16, #tpu.memory_space<vmem>>, vector<128x128xbf16>
    %cst_76 = arith.constant dense<0.000000e+00> : vector<64x128xf32>
    %83 = tpu.matmul %81, %82, %cst_76 {dimension_numbers = #tpu.dot_dimension_numbers<[1], [0], [0], [1], [0, 0, 1, 1], [], []>} : vector<64x128xbf16>, vector<128x128xbf16>, vector<64x128xf32> -> vector<64x128xf32>
    %84 = arith.truncf %83 : vector<64x128xf32> to vector<64x128xbf16>
    %c0_77 = arith.constant 0 : index
    %c0_78 = arith.constant 0 : index
    %c0_79 = arith.constant 0 : index
    %85 = vector.load %arg7[%c0_77, %c0_78, %c0_79] : memref<1x64x128xbf16, #tpu.memory_space<vmem>>, vector<1x64x128xbf16>
    %86 = vector.shape_cast %85 : vector<1x64x128xbf16> to vector<64x128xbf16>
    %87 = vector.shape_cast %84 : vector<64x128xbf16> to vector<1x64x128xbf16>
    tpu.vector_store %arg7[%c0_77, %c0_78, %c0_79], %87 {strides = array<i32>} : memref<1x64x128xbf16, #tpu.memory_space<vmem>>, vector<1x64x128xbf16>,
    %cst_80 = arith.constant dense<0.000000e+00> : vector<128xf32>
    %88 = vector.multi_reduction <add>, %83, %cst_80 [0] : vector<64x128xf32> to vector<128xf32>
    %89 = vector.shape_cast %88 : vector<128xf32> to vector<1x128xf32>
    %c0_81 = arith.constant 0 : index
    %c0_82 = arith.constant 0 : index
    %c0_83 = arith.constant 0 : index
    %90 = vector.load %arg8[%c0_81, %c0_82, %c0_83] : memref<1x1x128xf32, #tpu.memory_space<vmem>>, vector<1x1x128xf32>
    %91 = vector.shape_cast %90 : vector<1x1x128xf32> to vector<1x128xf32>
    %92 = vector.shape_cast %89 : vector<1x128xf32> to vector<1x1x128xf32>
    tpu.vector_store %arg8[%c0_81, %c0_82, %c0_83], %92 {strides = array<i32>} : memref<1x1x128xf32, #tpu.memory_space<vmem>>, vector<1x1x128xf32>,
    %93 = arith.mulf %83, %83 : vector<64x128xf32>
    %cst_84 = arith.constant dense<0.000000e+00> : vector<128xf32>
    %94 = vector.multi_reduction <add>, %93, %cst_84 [0] : vector<64x128xf32> to vector<128xf32>
    %95 = vector.shape_cast %94 : vector<128xf32> to vector<1x128xf32>
    %c0_85 = arith.constant 0 : index
    %c0_86 = arith.constant 0 : index
    %c0_87 = arith.constant 0 : index
    %96 = vector.load %arg9[%c0_85, %c0_86, %c0_87] : memref<1x1x128xf32, #tpu.memory_space<vmem>>, vector<1x1x128xf32>
    %97 = vector.shape_cast %96 : vector<1x1x128xf32> to vector<1x128xf32>
    %98 = vector.shape_cast %95 : vector<1x128xf32> to vector<1x1x128xf32>
    tpu.vector_store %arg9[%c0_85, %c0_86, %c0_87], %98 {strides = array<i32>} : memref<1x1x128xf32, #tpu.memory_space<vmem>>, vector<1x1x128xf32>,
    return
  }
  func.func @transform_0(%arg0: i32) -> (i32, i32, i32, i32) {
    %c0_i32 = arith.constant 0 : i32
    %c0_i32_0 = arith.constant 0 : i32
    %c0_i32_1 = arith.constant 0 : i32
    %c0_i32_2 = arith.constant 0 : i32
    return %arg0, %c0_i32, %c0_i32_0, %c0_i32_1 : i32, i32, i32, i32
  }
  func.func @transform_1(%arg0: i32) -> (i32, i32, i32) {
    %c0_i32 = arith.constant 0 : i32
    %c0_i32_0 = arith.constant 0 : i32
    %c0_i32_1 = arith.constant 0 : i32
    %c0_i32_2 = arith.constant 0 : i32
    return %c0_i32, %c0_i32_0, %c0_i32_1 : i32, i32, i32
  }
  func.func @transform_2(%arg0: i32) -> (i32, i32) {
    %c0_i32 = arith.constant 0 : i32
    %c0_i32_0 = arith.constant 0 : i32
    %c0_i32_1 = arith.constant 0 : i32
    return %c0_i32, %c0_i32_0 : i32, i32
  }
  func.func @transform_3(%arg0: i32) -> (i32, i32, i32) {
    %c0_i32 = arith.constant 0 : i32
    %c0_i32_0 = arith.constant 0 : i32
    %c0_i32_1 = arith.constant 0 : i32
    return %arg0, %c0_i32, %c0_i32_0 : i32, i32, i32
  }
  func.func @transform_4(%arg0: i32) -> (i32, i32, i32) {
    %c0_i32 = arith.constant 0 : i32
    %c0_i32_0 = arith.constant 0 : i32
    %c0_i32_1 = arith.constant 0 : i32
    return %arg0, %c0_i32, %c0_i32_0 : i32, i32, i32
  }
  func.func @transform_5(%arg0: i32) -> (i32, i32, i32) {
    %c0_i32 = arith.constant 0 : i32
    %c0_i32_0 = arith.constant 0 : i32
    %c0_i32_1 = arith.constant 0 : i32
    return %arg0, %c0_i32, %c0_i32_0 : i32, i32, i32
  }
  func.func @transform_6(%arg0: i32) -> (i32, i32, i32) {
    %c0_i32 = arith.constant 0 : i32
    %c0_i32_0 = arith.constant 0 : i32
    %c0_i32_1 = arith.constant 0 : i32
    return %arg0, %c0_i32, %c0_i32_0 : i32, i32, i32
  }
  func.func @transform_7(%arg0: i32) -> (i32, i32, i32) {
    %c0_i32 = arith.constant 0 : i32
    %c0_i32_0 = arith.constant 0 : i32
    %c0_i32_1 = arith.constant 0 : i32
    return %arg0, %c0_i32, %c0_i32_0 : i32, i32, i32
  }
  func.func @transform_8(%arg0: i32) -> (i32, i32, i32) {
    %c0_i32 = arith.constant 0 : i32
    %c0_i32_0 = arith.constant 0 : i32
    %c0_i32_1 = arith.constant 0 : i32
    return %arg0, %c0_i32, %c0_i32_0 : i32, i32, i32
  }
}

</mosaic_0001>

<bundles_post_ra>
// kernel: tpu_custom_call.1
= control target key start
LH: loop header
LB: loop body
LE: loop exit
PB: predicated region body
PF: predicated region fallthrough
CT: control target
= control target key end

     0   :  { %s4820_s0 = inlined_call_operand.vmem [shape: bf16[2,36,9,128], index: 0, kind: input, shape index: {}]   ;;  %s4821_s1 = inlined_call_operand.vmem [shape: bf16[9,128,128], index: 1, kind: input, shape index: {}]   ;;  %s4822_s2 = inlined_call_operand.vmem [shape: bf16[128,128], index: 2, kind: input, shape index: {}]   ;;  %s4823_s3 = inlined_call_operand.hbm [shape: bf16[2,64,128], index: 3, kind: output, shape index: {0}]   ;;  %s4824_s4 = inlined_call_operand.hbm [shape: f32[2,1,128], index: 4, kind: output, shape index: {1}]   ;;  %s4825_s5 = inlined_call_operand.hbm [shape: f32[2,1,128], index: 5, kind: output, shape index: {2}]   ;;  %s4826_s6 = inlined_call_operand.hbm [shape: bf16[2,64,128], index: 6, kind: output, shape index: {3}]   ;;  %s4827_s7 = inlined_call_operand.hbm [shape: f32[2,1,128], index: 7, kind: output, shape index: {4}]   ;;  %s4828_s8 = inlined_call_operand.hbm [shape: f32[2,1,128], index: 8, kind: output, shape index: {5}]  }
   0x1   :  { %4834 = sst [smem:[#allocation16_spill]] %s4820_s0 }
   0x2   :  { %4835 = sst [smem:[#allocation17_spill]] %s4821_s1 }
   0x3   :  { %4836 = sst [smem:[#allocation18_spill]] %s4822_s2 }
   0x4   :  { %4837 = sst [smem:[#allocation19_spill]] %s4823_s3 }
   0x5   :  { %4838 = sst [smem:[#allocation20_spill]] %s4826_s6 }
   0x6   :  { %14 = vsyncpa [#allocation3], 0 }
   0x7   :  { %16 = vsyncpa [#allocation3 + $0x1], 0 }
   0x8   :  { %17 = vsyncpa [#allocation5], 0 }
   0x9   :  { %19 = vsyncpa [#allocation5 + $0x1], 0 }
   0xa   :  { %20 = vsyncpa [#allocation8], 0 }
   0xb   :  { %22 = vsyncpa [#allocation8 + $0x1], 0 }
   0xc   :  { %23 = vsyncpa [#allocation11], 0 }
   0xd   :  { %25 = vsyncpa [#allocation11 + $0x1], 0  ;;  %s4114_s27 = smov 0   ;;  %s4116_s28 = smov 0  }
   0xe   :  { %s4118_s29 = smov 0   ;;  %s4120_s30 = smov 0  }
   0xf LB: > { %s4135_s9 = sadd.s32 4294967295, %s4059_s30   ;;  %s4829_s10 = sadd.s32 4294967294, %s4059_s30   ;;  %s4059_s30 = sphi %s4120_s30, %s4856_s30   ;;  %s4055_s29 = sphi %s4118_s29, %s4855_s29   ;;  %s4051_s28 = sphi %s4116_s28, %s4854_s28   ;;  %s4047_s27 = sphi %s4114_s27, %s4853_s27  }
  0x10   : > { %s4139_s11 = sadd.s32 1, %s4059_s30   ;;  %s106_s12 = sadd.s32 1, %s4055_s29 }
  0x11   : > { %s103_s13 = ssub.s32 %s4059_s30, %s4139_s11  ;;  %p116_p0 = scmp.ne.s32.totalorder %s4055_s29, %s4051_s28 }
  0x12   : > { %p104_p1 = scmp.eq.s32.totalorder %s103_s13, 0  ;;  %p117_p2 = scmp.eq.s32.totalorder %s4135_s9, 1 }
  0x13   : > { %p122_p3 = scmp.ne.s32.totalorder %s4051_s28, %s4047_s27  ;;  %p123_p4 = scmp.eq.s32.totalorder %s4829_s10, 1 }
  0x14   : > { %s4152_s14 = scalar_select %p104_p1, %s4055_s29, %s106_s12  }
  0x15   : > { %p4154_p5 = por %p117_p2, %p116_p0  ;;  %p4158_p6 = por %p123_p4, %p122_p3 }
  0x16   : > { %p2822_p7 = scmp.ge.s32.totalorder %s4059_s30, 1  ;;  %p285_p8 = scmp.lt.s32.totalorder %s4059_s30, 3 }
  0x18   : > { %p286_p9 = pnand %p2822_p7, %p285_p8 }
  0x19   : > { %s4841_s1 = sld [smem:[#allocation17_spill]] (!%p286_p9)  ;;  %p340_p10 = scmp.lt.s32.totalorder (!%p286_p9), %s4135_s9, 1  ;;  %vm686_vm0 = vsmask.f32 (!%p286_p9), 3328  ;;  %vm687_vm1 = vsmask.f32 (!%p286_p9), 7440 }
  0x1a   : > { %289 = sbr.rel (%p286_p9) target bundleno = 563 (0x233), region = 32  ;;  %s4842_s0 = sld [smem:[#allocation16_spill]] (!%p286_p9)  ;;  %vm4270_vm2 = vmor (!%p286_p9), %vm686_vm0, %vm687_vm1 }
  0x1b   : > { %s4845_s2 = sld [smem:[#allocation18_spill]] (!%p286_p9)  ;;  %s4544_s26 = sand.u32 (!%p286_p9), 1, %s4051_s28  }
  0x1c   : > { %s2823_s12 = sshll.u32 (!%p286_p9), %s4544_s26, 5  ;;  %s4830_s19 = sand.u32 (!%p286_p9), 1, %s4135_s9  }
  0x1d   : > { %s4551_s13 = scalar_lea.vmem (!%p286_p9), [#allocation2], %s2823_s12  ;;  %s3198_s20 = sshll.u32 (!%p286_p9), %s4135_s9, 9 }
  0x1e   : > { %s2551_s21 = sshll.u32 (!%p286_p9), %s4551_s13, 4  ;;  %s4846_s6 = sld [smem:[#allocation20_spill]] (!%p286_p9)  ;;  %s4590_s21 = int_to_ptr.vmem [resolvable:$true] %s2551_s21 }
  0x1f   : > { %v3737_v0 = vld [vmem:[%s4841_s1 + $0x40] sm:$0xff] (!%p286_p9)   ;;  %v3739_v2 = vld [vmem:[%s4841_s1 + $0x48] sm:$0xff] (!%p286_p9)   ;;  %v3741_v4 = vld [vmem:[%s4841_s1 + $0x50] sm:$0xff] (!%p286_p9)   ;;  %s4847_s3 = sld [smem:[#allocation19_spill]] (!%p286_p9) }
  0x20   : > { %v3738_v1 = vld [vmem:[%s4841_s1 + $0x100] sm:$0xff] (!%p286_p9)   ;;  %3366 = vmatprep.subr.bf16.mxu1 (!%p286_p9), %v3737_v0  ;;  %v3740_v3 = vld [vmem:[%s4841_s1 + $0x108] sm:$0xff] (!%p286_p9)   ;;  %v3742_v5 = vld [vmem:[%s4841_s1 + $0x110] sm:$0xff] (!%p286_p9)  }
  0x21   : > { %3462 = vmatprep.subr.bf16.mxu0 %v3738_v1  ;;  %3367 = vmatpush3.bf16.msra.mxu1 %v3737_v0  ;;  %s341_s17 = scalar_select %p340_p10, %s4135_s9, 1  ;;  %v3743_v6 = vld [vmem:[%s4841_s1 + $0x58] sm:$0xff]   ;;  %v3745_v8 = vld [vmem:[%s4841_s1 + $0x60] sm:$0xff]   ;;  %v3747_v10 = vld [vmem:[%s4841_s1 + $0x68] sm:$0xff]  }
  0x22   : > { %3463 = vmatpush3.bf16.msra.mxu0 %v3738_v1  ;;  %3368 = vmatprep.subr.bf16.mxu1 %v3739_v2  ;;  %v3744_v7 = vld [vmem:[%s4841_s1 + $0x118] sm:$0xff]   ;;  %v3746_v9 = vld [vmem:[%s4841_s1 + $0x120] sm:$0xff]   ;;  %v3748_v12 = vld [vmem:[%s4841_s1 + $0x128] sm:$0xff]  }
  0x23   : > { %3464 = vmatprep.subr.bf16.mxu0 %v3740_v3  ;;  %s3670_s22 = smul.u32 288, %s341_s17  ;;  %v3749_v14 = vld [vmem:[%s4841_s1 + $0x70] sm:$0xff]   ;;  %v3751_v16 = vld [vmem:[%s4841_s1 + $0x78] sm:$0xff]   ;;  %v3754_v18 = vld [vmem:[%s4841_s1] sm:$0xff]  }
  0x24   : > { %v3750_v15 = vld [vmem:[%s4841_s1 + $0x130] sm:$0xff]   ;;  %v3752_v17 = vld [vmem:[%s4841_s1 + $0x138] sm:$0xff]   ;;  %v3756_v19 = vld [vmem:[%s4841_s1 + $0x140] sm:$0xff]   ;;  %s4580_s24 = scalar_lea.hbm %s4846_s6, %s3198_s20 }
  0x25   : > { %3369 = vmatpush3.bf16.msra.mxu1 %v3739_v2  ;;  %s4199_s18 = scalar_lea.vmem %s4842_s0, %s3670_s22  ;;  %v3759_v22 = vld [vmem:[%s4841_s1 + $0x8] sm:$0xff]   ;;  %v3761_v26 = vld [vmem:[%s4841_s1 + $0x10] sm:$0xff]   ;;  %v3763_v28 = vld [vmem:[%s4841_s1 + $0x18] sm:$0xff]   ;;  %s4588_s10 = scalar_lea.hbm %s4847_s3, %s3198_s20 }
  0x26   : > { %3465 = vmatpush3.bf16.msra.mxu0 %v3740_v3  ;;  %3370 = vmatprep.subr.bf16.mxu1 %v3741_v4  ;;  %v3753_v11 = vld [vmem:[%s4199_s18 + $0x48] ss:$8 sps:$4 sm:$0xff]   ;;  %v3755_v13 = vld [vmem:[%s4199_s18 + $0xd8] ss:$8 sps:$4 sm:$0xff]   ;;  %v2975_v34 = vld [vmem:[%s4199_s18 + $0x94] sm:$0x1] }
  0x27   : > { %3466 = vmatprep.subr.bf16.mxu0 %v3742_v5  ;;  %3382 = vmatprep.mubr.bf16.mxu1 %v3753_v11  ;;  %v3757_v20 = vld [vmem:[%s4199_s18 + $0x58] ss:$8 sps:$4 sm:$0xff]   ;;  %v3758_v21 = vld [vmem:[%s4199_s18 + $0xe8] ss:$8 sps:$4 sm:$0xff]   ;;  %v2977_v39 = vld [vmem:[%s4199_s18 + $0x9c] sm:$0x1] }
  0x28   : > { %3478 = vmatprep.mubr.bf16.mxu0 %v3755_v13  ;;  %v3760_v23 = vld [vmem:[%s4841_s1 + $0x148] sm:$0xff]   ;;  %v3771_v25 = vld [vmem:[%s4199_s18 + $0xf8] ss:$8 sps:$4 sm:$0xff]   ;;  %v3762_v27 = vld [vmem:[%s4841_s1 + $0x150] sm:$0xff]   ;;  %v1323_v40 = vshll.u32 %v2975_v34, 16  ;;  %v1337_v46 = vshll.u32 %v2977_v39, 16 }
  0x29   : > { %3371 = vmatpush3.bf16.msra.mxu1 %v3741_v4  ;;  %v3769_v24 = vld [vmem:[%s4199_s18 + $0x68] ss:$8 sps:$4 sm:$0xff]   ;;  %v3773_v29 = vld [vmem:[%s4199_s18 + $0x78] ss:$8 sps:$4 sm:$0xff]   ;;  %v2979_v57 = vld [vmem:[%s4199_s18 + $0xa4] sm:$0x1] }
  0x2a   : > { %3467 = vmatpush3.bf16.msra.mxu0 %v3742_v5  ;;  %3372 = vmatprep.subr.bf16.mxu1 %v3743_v6  ;;  %v3774_v30 = vld [vmem:[%s4199_s18 + $0x108] ss:$8 sps:$4 sm:$0xff]   ;;  %v3764_v31 = vld [vmem:[%s4841_s1 + $0x158] sm:$0xff]   ;;  %v3765_v38 = vld [vmem:[%s4841_s1 + $0x20] sm:$0xff]   ;;  %v1325_v52 = vrot.slane %v1323_v40, 5  ;;  %v1339_v55 = vrot.slane %v1337_v46, 5 }
  0x2b   : > { %3468 = vmatprep.subr.bf16.mxu0 %v3744_v7  ;;  %v3777_v32 = vld [vmem:[%s4199_s18] ss:$8 sps:$4 sm:$0xff]   ;;  %v2974_v33 = vld [vmem:[%s4199_s18 + $0x90] sm:$0xf]  ;;  %v2976_v35 = vld [vmem:[%s4199_s18 + $0x98] sm:$0xf] }
  0x2c   : > { %v1314_v36 = vshrl.u32 %v2974_v33, 16  ;;  %v1317_v37 = vshll.u32 %v2974_v33, 16  ;;  %v1328_v41 = vshrl.u32 %v2976_v35, 16  ;;  %v1331_v42 = vshll.u32 %v2976_v35, 16  ;;  %v3766_v43 = vld [vmem:[%s4841_s1 + $0x160] sm:$0xff]   ;;  %v3767_v47 = vld [vmem:[%s4841_s1 + $0x28] sm:$0xff]  }
  0x2d   : > { %3373 = vmatpush3.bf16.msra.mxu1 %v3743_v6  ;;  %v3768_v50 = vld [vmem:[%s4841_s1 + $0x168] sm:$0xff]   ;;  %v2978_v56 = vld [vmem:[%s4199_s18 + $0xa0] sm:$0xf]  ;;  %v1351_v0 = vshll.u32 %v2979_v57, 16  ;;  %v3770_v2 = vld [vmem:[%s4841_s1 + $0x30] sm:$0xff]   ;;  %s4594_s22 = scalar_lea.sflag [#allocation8], %s4830_s19 }
  0x2e   : > { %3469 = vmatpush3.bf16.msra.mxu0 %v3744_v7  ;;  %3374 = vmatprep.subr.bf16.mxu1 %v3745_v8  ;;  %v1316_v44 = vrot.slane %v1314_v36, 4  ;;  %v1319_v45 = vrot.slane %v1317_v37, 5  ;;  %v1330_v48 = vrot.slane %v1328_v41, 4  ;;  %v1333_v49 = vrot.slane %v1331_v42, 5  ;;  %v2980_v59 = vld [vmem:[%s4199_s18 + $0xa8] sm:$0xf] }
  0x2f   : > { %3470 = vmatprep.subr.bf16.mxu0 %v3746_v9  ;;  %v2981_v60 = vld [vmem:[%s4199_s18 + $0xac] sm:$0x1]  ;;  %v1342_v61 = vshrl.u32 %v2978_v56, 16  ;;  %v1345_v63 = vshll.u32 %v2978_v56, 16  ;;  %v1356_v1 = vshrl.u32 %v2980_v59, 16  ;;  %v1359_v5 = vshll.u32 %v2980_v59, 16 }
  0x30   : > { %v1320_v51 = vor.u32 %v1319_v45, %v1316_v44  ;;  %v1334_v54 = vor.u32 %v1333_v49, %v1330_v48  ;;  %v3772_v6 = vld [vmem:[%s4841_s1 + $0x170] sm:$0xff]   ;;  %v3791_v37 = vld [vmem:[%s4199_s18 + $0x20] ss:$8 sps:$4 sm:$0xff]   ;;  %v3785_v59 = vld [vmem:[%s4841_s1 + $0x98] sm:$0xff]   ;;  %s4061_s0 = smov [#allocation7]  }
  0x31   : > { %3375 = vmatpush3.bf16.msra.mxu1 %v3745_v8  ;;  %v1344_v4 = vrot.slane %v1342_v61, 4  ;;  %v1347_v8 = vrot.slane %v1345_v63, 5  ;;  %v1361_v13 = vrot.slane %v1359_v5, 5  ;;  %v3794_v48 = vld [vmem:[%s4199_s18 + $0x30] ss:$8 sps:$4 sm:$0xff]  }
  0x32   : > { %3471 = vmatpush3.bf16.msra.mxu0 %v3746_v9  ;;  %3376 = vmatprep.subr.bf16.mxu1 %v3747_v10  ;;  %v1321_v58 = vrot.slane %v1320_v51, 4  ;;  %v1335_v62 = vrot.slane %v1334_v54, 4  ;;  %v1358_v9 = vrot.slane %v1356_v1, 4  ;;  %v2986_v49 = vld [vmem:[%s4199_s18 + $0xc0] sm:$0xf] }
  0x33   : > { %3472 = vmatprep.subr.bf16.mxu0 %v3748_v12  ;;  %v2988_v51 = vld [vmem:[%s4199_s18 + $0xc8] sm:$0xf]  ;;  %v1398_v56 = vshrl.u32 %v2986_v49, 16  ;;  %v1401_v57 = vshll.u32 %v2986_v49, 16 }
  0x34   : > { %v1326_v3 = vsel %vm4270_vm2, %v1321_v58, %v1325_v52  ;;  %v1340_v7 = vsel %vm4270_vm2, %v1335_v62, %v1339_v55  ;;  %v3784_v52 = vld [vmem:[%s4841_s1 + $0x190] sm:$0xff]   ;;  %v2989_v55 = vld [vmem:[%s4199_s18 + $0xcc] sm:$0x1]  ;;  %v1412_v61 = vshrl.u32 %v2988_v51, 16  ;;  %v1415_v62 = vshll.u32 %v2988_v51, 16 }
  0x35   : > { %3377 = vmatpush3.bf16.msra.mxu1 %v3747_v10  ;;  %v1365_v10 = vshll.u32 %v2981_v60, 16  ;;  %v3006_v11 = vcombine.low %v1326_v3, %v1340_v7  ;;  %v1421_v63 = vshll.u32 %v2989_v55, 16  ;;  %v1400_v1 = vrot.slane %v1398_v56, 4 }
  0x36   : > { %3473 = vmatpush3.bf16.msra.mxu0 %v3748_v12  ;;  %3378 = vmatprep.subr.bf16.mxu1 %v3749_v14  ;;  %v1353_v12 = vrot.slane %v1351_v0, 5  ;;  %v1417_v7 = vrot.slane %v1415_v62, 5 }
  0x37   : > { %3474 = vmatprep.subr.bf16.mxu0 %v3750_v15 }
  0x39   : > { %3379 = vmatpush3.bf16.msra.mxu1 %v3749_v14  ;;  %v3775_v14 = vld [vmem:[%s4841_s1 + $0x38] sm:$0xff]  }
  0x3a   : > { %3475 = vmatpush3.bf16.msra.mxu0 %v3750_v15  ;;  %3380 = vmatprep.subr.bf16.mxu1 %v3751_v16  ;;  %v1348_v15 = vor.u32 %v1347_v8, %v1344_v4  ;;  %v3786_v4 = vld [vmem:[%s4841_s1 + $0x198] sm:$0xff]   ;;  %v1423_v8 = vrot.slane %v1421_v63, 5 }
  0x3b   : > { %3476 = vmatprep.subr.bf16.mxu0 %v3752_v17 }
  0x3d   : > { %3381 = vmatpush3.bf16.msra.mxu1 %v3751_v16  ;;  %v1362_v16 = vor.u32 %v1361_v13, %v1358_v9  ;;  %v3787_v13 = vld [vmem:[%s4841_s1 + $0xa0] sm:$0xff]  }
  0x3e   : > { %3477 = vmatpush3.bf16.msra.mxu0 %v3752_v17  ;;  %3390 = vmatprep.subr.bf16.mxu1 %v3754_v18  ;;  %v1349_v17 = vrot.slane %v1348_v15, 4 }
  0x3f   : > { %3486 = vmatprep.subr.bf16.mxu0 %v3756_v19 }
  0x40   : > { %3383 = vmatmul.mubr.bf16.vlgmr.msra.gmra.mrb[0].mxu1 %v3757_v20  ;;  %v1363_v20 = vrot.slane %v1362_v16, 4  ;;  %v672_v16 = vld [vmem:[%s4199_s18 + $0x8] sm:$0xf] }
  0x41   : > { %3391 = vmatpush3.bf16.msra.mxu1 %v3754_v18  ;;  %3479 = vmatmul.mubr.bf16.vlgmr.msra.gmra.mrb[0].mxu0 %v3758_v21  ;;  %v1367_v18 = vrot.slane %v1365_v10, 5  ;;  %v3778_v21 = vld [vmem:[%s4841_s1 + $0x80] sm:$0xff]  }
  0x42   : > { %3487 = vmatpush3.bf16.msra.mxu0 %v3756_v19  ;;  %3392 = vmatprep.subr.bf16.mxu1 %v3759_v22  ;;  %v3776_v19 = vld [vmem:[%s4841_s1 + $0x178] sm:$0xff]  }
  0x43   : > { %3488 = vmatprep.subr.bf16.mxu0 %v3760_v23  ;;  %3386 = vmatprep.mubr.bf16.mxu1 %v3769_v24  ;;  %v3779_v24 = vld [vmem:[%s4841_s1 + $0x180] sm:$0xff]  }
  0x44   : > { %3482 = vmatprep.mubr.bf16.mxu0 %v3771_v25  ;;  %v3780_v25 = vld [vmem:[%s4199_s18 + $0x10] ss:$8 sps:$4 sm:$0xff]  }
  0x45   : > { %3393 = vmatpush3.bf16.msra.mxu1 %v3759_v22  ;;  %v1354_v22 = vsel %vm4270_vm2, %v1349_v17, %v1353_v12  ;;  %v671_v12 = vld [vmem:[%s4199_s18 + $0x4] sm:$0x1]  ;;  %v673_v17 = vld [vmem:[%s4199_s18 + $0xc] sm:$0x1] }
  0x46   : > { %3489 = vmatpush3.bf16.msra.mxu0 %v3760_v23  ;;  %3394 = vmatprep.subr.bf16.mxu1 %v3761_v26  ;;  %v1368_v23 = vsel %vm4270_vm2, %v1363_v20, %v1367_v18 }
  0x47   : > { %3490 = vmatprep.subr.bf16.mxu0 %v3762_v27 }
  0x48   : > { %3387 = vmatmul.mubr.bf16.gmra.mrb[4].mxu1 %v3773_v29  ;;  %v3782_v29 = vld [vmem:[%s4841_s1 + $0x188] sm:$0xff]  }
  0x49   : > { %3395 = vmatpush3.bf16.msra.mxu1 %v3761_v26  ;;  %3483 = vmatmul.mubr.bf16.gmra.mrb[4].mxu0 %v3774_v30  ;;  %v3781_v26 = vld [vmem:[%s4841_s1 + $0x88] sm:$0xff]   ;;  %v2983_v30 = vld [vmem:[%s4199_s18 + $0xb4] sm:$0x1] }
  0x4a   : > { %3491 = vmatpush3.bf16.msra.mxu0 %v3762_v27  ;;  %3396 = vmatprep.subr.bf16.mxu1 %v3763_v28  ;;  %v2982_v27 = vld [vmem:[%s4199_s18 + $0xb0] sm:$0xf]  ;;  %v1379_v35 = vshll.u32 %v2983_v30, 16 }
  0x4b   : > { %3492 = vmatprep.subr.bf16.mxu0 %v3764_v31  ;;  %3406 = vmatprep.mubr.bf16.mxu1 %v3777_v32  ;;  %v2985_v32 = vld [vmem:[%s4199_s18 + $0xbc] sm:$0x1]  ;;  %v1370_v33 = vshrl.u32 %v2982_v27, 16  ;;  %v1373_v34 = vshll.u32 %v2982_v27, 16  ;;  %v713_v27 = vshll.u32 %v673_v17, 16 }
  0x4c   : > { %3502 = vmatprep.mubr.bf16.mxu0 %v3006_v11  ;;  %v1393_v39 = vshll.u32 %v2985_v32, 16  ;;  %v1381_v44 = vrot.slane %v1379_v35, 5  ;;  %v670_v11 = vld [vmem:[%s4199_s18] sm:$0xf]  ;;  %v3789_v32 = vld [vmem:[%s4841_s1 + $0xa8] sm:$0xff]  }
  0x4d   : > { %3397 = vmatpush3.bf16.msra.mxu1 %v3763_v28  ;;  %v3007_v28 = vcombine.low %v1354_v22, %v1368_v23  ;;  %v1372_v40 = vrot.slane %v1370_v33, 4  ;;  %v1375_v41 = vrot.slane %v1373_v34, 5  ;;  %v690_v18 = vshrl.u32 %v670_v11, 16  ;;  %v681_v17 = vld [vmem:[%s4199_s18 + $0x2c] sm:$0x1] }
  0x4e   : > { %3493 = vmatpush3.bf16.msra.mxu0 %v3764_v31  ;;  %3398 = vmatprep.subr.bf16.mxu1 %v3765_v38  ;;  %v2984_v31 = vld [vmem:[%s4199_s18 + $0xb8] sm:$0xf]  ;;  %v1395_v46 = vrot.slane %v1393_v39, 5  ;;  %v704_v22 = vshrl.u32 %v672_v16, 16  ;;  %v707_v23 = vshll.u32 %v672_v16, 16 }
  0x4f   : > { %3494 = vmatprep.subr.bf16.mxu0 %v3766_v43  ;;  %v1384_v36 = vshrl.u32 %v2984_v31, 16  ;;  %v680_v16 = vld [vmem:[%s4199_s18 + $0x28] sm:$0xf] }
  0x50   : > { %v706_v30 = vrot.slane %v704_v22, 4  ;;  %v760_v22 = vshrl.u32 %v680_v16, 16 }
  0x51   : > { %3399 = vmatpush3.bf16.msra.mxu1 %v3765_v38  ;;  %v1387_v38 = vshll.u32 %v2984_v31, 16  ;;  %v1386_v42 = vrot.slane %v1384_v36, 4  ;;  %v709_v31 = vrot.slane %v707_v23, 5  ;;  %v715_v36 = vrot.slane %v713_v27, 5  ;;  %v682_v23 = vld [vmem:[%s4199_s18 + $0x30] sm:$0xf] }
  0x52   : > { %3495 = vmatpush3.bf16.msra.mxu0 %v3766_v43  ;;  %3400 = vmatprep.subr.bf16.mxu1 %v3767_v47  ;;  %v3783_v43 = vld [vmem:[%s4841_s1 + $0x90] sm:$0xff]   ;;  %v684_v27 = vld [vmem:[%s4199_s18 + $0x38] sm:$0xf] }
  0x53   : > { %3496 = vmatprep.subr.bf16.mxu0 %v3768_v50  ;;  %v1389_v45 = vrot.slane %v1387_v38, 5  ;;  %v3790_v38 = vld [vmem:[%s4841_s1 + $0x1a8] sm:$0xff]  }
  0x55   : > { %3401 = vmatpush3.bf16.msra.mxu1 %v3767_v47  ;;  %v1376_v47 = vor.u32 %v1375_v41, %v1372_v40  ;;  %v1390_v54 = vor.u32 %v1389_v45, %v1386_v42  ;;  %v710_v40 = vor.u32 %v709_v31, %v706_v30  ;;  %v674_v41 = vld [vmem:[%s4199_s18 + $0x10] sm:$0xf]  ;;  %v762_v31 = vrot.slane %v760_v22, 4 }
  0x56   : > { %3497 = vmatpush3.bf16.msra.mxu0 %v3768_v50  ;;  %3402 = vmatprep.subr.bf16.mxu1 %v3770_v2  ;;  %v2987_v50 = vld [vmem:[%s4199_s18 + $0xc4] sm:$0x1]  ;;  %v718_v45 = vshrl.u32 %v674_v41, 16  ;;  %v3835_v22 = vld [vmem:[%s4199_s18 + $0x70] ss:$8 sps:$4 sm:$0xff]  }
  0x57   : > { %3498 = vmatprep.subr.bf16.mxu0 %v3772_v6  ;;  %v1407_v58 = vshll.u32 %v2987_v50, 16  ;;  %v1377_v60 = vrot.slane %v1376_v47, 4  ;;  %v1391_v0 = vrot.slane %v1390_v54, 4  ;;  %v677_v47 = vld [vmem:[%s4199_s18 + $0x1c] sm:$0x1] }
  0x59   : > { %3403 = vmatpush3.bf16.msra.mxu1 %v3770_v2  ;;  %v1403_v2 = vrot.slane %v1401_v57, 5  ;;  %v1409_v3 = vrot.slane %v1407_v58, 5  ;;  %v1382_v5 = vsel %vm4270_vm2, %v1377_v60, %v1381_v44  ;;  %v1396_v9 = vsel %vm4270_vm2, %v1391_v0, %v1395_v46  ;;  %v676_v44 = vld [vmem:[%s4199_s18 + $0x18] sm:$0xf]  ;;  %v3793_v60 = vld [vmem:[%s4841_s1 + $0x1b0] sm:$0xff]  }
  0x5a   : > { %3499 = vmatpush3.bf16.msra.mxu0 %v3772_v6  ;;  %3404 = vmatprep.subr.bf16.mxu1 %v3775_v14  ;;  %v1414_v6 = vrot.slane %v1412_v61, 4  ;;  %v711_v46 = vrot.slane %v710_v40, 4  ;;  %v732_v50 = vshrl.u32 %v676_v44, 16  ;;  %v735_v54 = vshll.u32 %v676_v44, 16 }
  0x5b   : > { %3500 = vmatprep.subr.bf16.mxu0 %v3776_v19  ;;  %v1404_v10 = vor.u32 %v1403_v2, %v1400_v1  ;;  %v741_v58 = vshll.u32 %v677_v47, 16  ;;  %v788_v40 = vshrl.u32 %v684_v27, 16 }
  0x5c   : > { %v1418_v15 = vor.u32 %v1417_v7, %v1414_v6  ;;  %v716_v55 = vsel %vm4270_vm2, %v711_v46, %v715_v36  ;;  %v734_v57 = vrot.slane %v732_v50, 4  ;;  %v737_v63 = vrot.slane %v735_v54, 5  ;;  %v3796_v6 = vld [vmem:[%s4841_s1 + $0x1b8] sm:$0xff]   ;;  %v3797_v7 = vld [vmem:[%s4841_s1 + $0xc0] sm:$0xff]  }
  0x5d   : > { %3405 = vmatpush3.bf16.msra.mxu1 %v3775_v14  ;;  %v3008_v14 = vcombine.low %v1382_v5, %v1396_v9  ;;  %v1405_v20 = vrot.slane %v1404_v10, 4  ;;  %v3799_v10 = vld [vmem:[%s4841_s1 + $0x1c0] sm:$0xff]   ;;  %v777_v36 = vshll.u32 %v682_v23, 16 }
  0x5e   : > { %3501 = vmatpush3.bf16.msra.mxu0 %v3776_v19  ;;  %3414 = vmatprep.subr.bf16.mxu1 %v3778_v21  ;;  %v693_v19 = vshll.u32 %v670_v11, 16  ;;  %v738_v1 = vor.u32 %v737_v63, %v734_v57  ;;  %v3800_v11 = vld [vmem:[%s4199_s18 + $0x18] ss:$8 sps:$4 sm:$0xff]  }
  0x5f   : > { %3510 = vmatprep.subr.bf16.mxu0 %v3779_v24 }
  0x60   : > { %3407 = vmatmul.mubr.bf16.vlgmr.msra.gmra.mrb[0].mxu1 %v3780_v25  ;;  %v692_v25 = vrot.slane %v690_v18, 4  ;;  %v739_v5 = vrot.slane %v738_v1, 4  ;;  %v3802_v18 = vld [vmem:[%s4841_s1 + $0x1c8] sm:$0xff]   ;;  %v3807_v1 = vld [vmem:[%s4841_s1 + $0xe0] sm:$0xff]  }
  0x61   : > { %3415 = vmatpush3.bf16.msra.mxu1 %v3778_v21  ;;  %3503 = vmatmul.mubr.bf16.vlgmr.msra.gmra.mrb[0].mxu0 %v3007_v28  ;;  %v699_v21 = vshll.u32 %v671_v12, 16  ;;  %v3788_v28 = vld [vmem:[%s4841_s1 + $0x1a0] sm:$0xff]  }
  0x62   : > { %3511 = vmatpush3.bf16.msra.mxu0 %v3779_v24  ;;  %3416 = vmatprep.subr.bf16.mxu1 %v3781_v26  ;;  %v1419_v24 = vrot.slane %v1418_v15, 4  ;;  %v678_v12 = vld [vmem:[%s4199_s18 + $0x20] sm:$0xf]  ;;  %v679_v15 = vld [vmem:[%s4199_s18 + $0x24] sm:$0x1] }
  0x63   : > { %3512 = vmatprep.subr.bf16.mxu0 %v3782_v29  ;;  %3410 = vmatprep.mubr.bf16.mxu1 %v3791_v37  ;;  %v701_v35 = vrot.slane %v699_v21, 5  ;;  %v3798_v37 = vld [vmem:[%s4199_s18 + $0x8] ss:$8 sps:$4 sm:$0xff]   ;;  %v755_v21 = vshll.u32 %v679_v15, 16  ;;  %v3821_v15 = vld [vmem:[%s4845_s2] sm:$0xff]  }
  0x64   : > { %3506 = vmatprep.mubr.bf16.mxu0 %v3008_v14  ;;  %v1424_v33 = vsel %vm4270_vm2, %v1419_v24, %v1423_v8  ;;  %v3801_v14 = vld [vmem:[%s4841_s1 + $0xc8] sm:$0xff]   ;;  %v763_v24 = vshll.u32 %v680_v16, 16  ;;  %v3820_v16 = vld [vmem:[%s4841_s1 + $0x200] sm:$0xff]  }
  0x65   : > { %3417 = vmatpush3.bf16.msra.mxu1 %v3781_v26  ;;  %v695_v26 = vrot.slane %v693_v19, 5  ;;  %v746_v19 = vshrl.u32 %v678_v12, 16  ;;  %v757_v30 = vrot.slane %v755_v21, 5  ;;  %v3828_v21 = vld [vmem:[%s4845_s2 + $0x10] sm:$0xff]  }
  0x66   : > { %3513 = vmatpush3.bf16.msra.mxu0 %v3782_v29  ;;  %3418 = vmatprep.subr.bf16.mxu1 %v3783_v43  ;;  %v1410_v29 = vsel %vm4270_vm2, %v1405_v20, %v1409_v3  ;;  %v743_v3 = vrot.slane %v741_v58, 5  ;;  %v749_v20 = vshll.u32 %v678_v12, 16  ;;  %v3805_v58 = vld [vmem:[%s4841_s1 + $0xd8] sm:$0xff]  }
  0x67   : > { %3514 = vmatprep.subr.bf16.mxu0 %v3784_v52  ;;  %v696_v34 = vor.u32 %v695_v26, %v692_v25  ;;  %v3009_v39 = vcombine.low %v1410_v29, %v1424_v33  ;;  %v769_v25 = vshll.u32 %v681_v17, 16  ;;  %v683_v26 = vld [vmem:[%s4199_s18 + $0x34] sm:$0x1]  ;;  %v765_v33 = vrot.slane %v763_v24, 5  ;;  %v3815_v12 = vld [vmem:[%s4841_s1 + $0xf8] sm:$0xff]  }
  0x68   : > { %3411 = vmatmul.mubr.bf16.gmra.mrb[4].mxu1 %v3794_v48  ;;  %v721_v48 = vshll.u32 %v674_v41, 16  ;;  %v744_v9 = vsel %vm4270_vm2, %v739_v5, %v743_v3  ;;  %v751_v29 = vrot.slane %v749_v20, 5  ;;  %v791_v41 = vshll.u32 %v684_v27, 16  ;;  %v3808_v5 = vld [vmem:[%s4841_s1 + $0x1e0] sm:$0xff]   ;;  %v3825_v20 = vld [vmem:[%s4199_s18 + $0xb0] ss:$8 sps:$4 sm:$0xff]  }
  0x69   : > { %3419 = vmatpush3.bf16.msra.mxu1 %v3783_v43  ;;  %v697_v42 = vrot.slane %v696_v34, 4  ;;  %v675_v43 = vld [vmem:[%s4199_s18 + $0x14] sm:$0x1]  ;;  %3507 = vmatmul.mubr.bf16.gmra.mrb[4].mxu0 %v3009_v39  ;;  %v771_v34 = vrot.slane %v769_v25, 5  ;;  %v783_v39 = vshll.u32 %v683_v26, 16 }
  0x6a   : > { %3515 = vmatpush3.bf16.msra.mxu0 %v3784_v52  ;;  %3420 = vmatprep.subr.bf16.mxu1 %v3785_v59  ;;  %v727_v49 = vshll.u32 %v675_v43, 16  ;;  %v720_v52 = vrot.slane %v718_v45, 4  ;;  %v723_v56 = vrot.slane %v721_v48, 5  ;;  %v766_v43 = vor.u32 %v765_v33, %v762_v31  ;;  %v3822_v17 = vld [vmem:[%s4199_s18 + $0x60] ss:$8 sps:$4 sm:$0xff]   ;;  %v3827_v33 = vld [vmem:[%s4841_s1 + $0x210] sm:$0xff]  }
  0x6b   : > { %3516 = vmatprep.subr.bf16.mxu0 %v3786_v4  ;;  %v702_v51 = vsel %vm4270_vm2, %v697_v42, %v701_v35  ;;  %3526 = vmatprep.mubr.bf16.mxu0 %v3798_v37  ;;  %v774_v35 = vshrl.u32 %v682_v23, 16  ;;  %v3803_v37 = vld [vmem:[%s4841_s1 + $0xd0] sm:$0xff]   ;;  %v779_v45 = vrot.slane %v777_v36, 5  ;;  %v785_v48 = vrot.slane %v783_v39, 5  ;;  %v3090_v23 = vld [vmem:[%s4199_s18 + $0x8] sm:$0xf] }
  0x6c   : > { %v2890_v61 = vcombine.low %v702_v51, %v716_v55  ;;  %v729_v62 = vrot.slane %v727_v49, 5  ;;  %v724_v0 = vor.u32 %v723_v56, %v720_v52  ;;  %v3804_v42 = vld [vmem:[%s4841_s1 + $0x1d0] sm:$0xff]   ;;  %v790_v49 = vrot.slane %v788_v40, 4  ;;  %v3091_v24 = vld [vmem:[%s4199_s18 + $0xc] sm:$0x1] }
  0x6d   : > { %3421 = vmatpush3.bf16.msra.mxu1 %v3785_v59  ;;  %v3792_v59 = vld [vmem:[%s4841_s1 + $0xb0] sm:$0xff]   ;;  %v776_v44 = vrot.slane %v774_v35, 4  ;;  %v793_v50 = vrot.slane %v791_v41, 5  ;;  %v767_v51 = vrot.slane %v766_v43, 4  ;;  %v1938_v27 = vshrl.u32 %v3090_v23, 16  ;;  %v3830_v43 = vld [vmem:[%s4845_s2 + $0x18] sm:$0xff]  }
  0x6e   : > { %3517 = vmatpush3.bf16.msra.mxu0 %v3786_v4  ;;  %3422 = vmatprep.subr.bf16.mxu1 %v3787_v13  ;;  %v725_v2 = vrot.slane %v724_v0, 4  ;;  %v3795_v4 = vld [vmem:[%s4841_s1 + $0xb8] sm:$0xff]   ;;  %v3812_v55 = vld [vmem:[%s4199_s18 + $0x28] ss:$8 sps:$4 sm:$0xff]   ;;  %v3093_v26 = vld [vmem:[%s4199_s18 + $0x14] sm:$0x1] }
  0x6f   : > { %3518 = vmatprep.subr.bf16.mxu0 %v3788_v28  ;;  %3430 = vmatprep.mubr.bf16.mxu1 %v2890_v61  ;;  %v780_v52 = vor.u32 %v779_v45, %v776_v44  ;;  %v794_v57 = vor.u32 %v793_v50, %v790_v49  ;;  %v3814_v61 = vld [vmem:[%s4199_s18 + $0x38] ss:$8 sps:$4 sm:$0xff]   ;;  %v3092_v25 = vld [vmem:[%s4199_s18 + $0x10] sm:$0xf] }
  0x70   : > { %v730_v8 = vsel %vm4270_vm2, %v725_v2, %v729_v62  ;;  %v3806_v62 = vld [vmem:[%s4841_s1 + $0x1d8] sm:$0xff]   ;;  %v1955_v31 = vshll.u32 %v3092_v25, 16  ;;  %v3826_v36 = vld [vmem:[%s4199_s18 + $0xc0] ss:$8 sps:$4 sm:$0xff]  }
  0x71   : > { %3423 = vmatpush3.bf16.msra.mxu1 %v3787_v13  ;;  %v2891_v13 = vcombine.low %v730_v8, %v744_v9  ;;  %v795_v0 = vrot.slane %v794_v57, 4  ;;  %v3809_v8 = vld [vmem:[%s4841_s1 + $0xe8] sm:$0xff]   ;;  %v3841_v49 = vld [vmem:[%s4199_s18 + $0xd8] ss:$8 sps:$4 sm:$0xff]  }
  0x72   : > { %3519 = vmatpush3.bf16.msra.mxu0 %v3788_v28  ;;  %3424 = vmatprep.subr.bf16.mxu1 %v3789_v32  ;;  %v748_v28 = vrot.slane %v746_v19, 4  ;;  %v3810_v9 = vld [vmem:[%s4841_s1 + $0x1e8] sm:$0xff]  }
  0x73   : > { %3520 = vmatprep.subr.bf16.mxu0 %v3790_v38  ;;  %v3824_v19 = vld [vmem:[%s4845_s2 + $0x8] sm:$0xff]  }
  0x74   : > { %v3836_v39 = vld [vmem:[%s4199_s18 + $0x80] ss:$8 sps:$4 sm:$0xff]  }
  0x75   : > { %3425 = vmatpush3.bf16.msra.mxu1 %v3789_v32  ;;  %v685_v32 = vld [vmem:[%s4199_s18 + $0x3c] sm:$0x1]  ;;  %v3098_v57 = vld [vmem:[%s4199_s18 + $0x28] sm:$0xf] }
  0x76   : > { %3521 = vmatpush3.bf16.msra.mxu0 %v3790_v38  ;;  %3426 = vmatprep.subr.bf16.mxu1 %v3792_v59  ;;  %v752_v38 = vor.u32 %v751_v29, %v748_v28  ;;  %v797_v46 = vshll.u32 %v685_v32, 16  ;;  %v1941_v28 = vshll.u32 %v3090_v23, 16  ;;  %v1947_v29 = vshll.u32 %v3091_v24, 16  ;;  %v3838_v23 = vld [vmem:[%s4845_s2 + $0x30] sm:$0xff]  }
  0x77   : > { %3522 = vmatprep.subr.bf16.mxu0 %v3793_v60  ;;  %v1961_v32 = vshll.u32 %v3093_v26, 16 }
  0x78   : > { %v753_v47 = vrot.slane %v752_v38, 4  ;;  %v799_v54 = vrot.slane %v797_v46, 5  ;;  %v1943_v35 = vrot.slane %v1941_v28, 5  ;;  %v1957_v38 = vrot.slane %v1955_v31, 5  ;;  %v3096_v46 = vld [vmem:[%s4199_s18 + $0x20] sm:$0xf] }
  0x79   : > { %3427 = vmatpush3.bf16.msra.mxu1 %v3792_v59  ;;  %v772_v59 = vsel %vm4270_vm2, %v767_v51, %v771_v34  ;;  %v1940_v34 = vrot.slane %v1938_v27, 4  ;;  %v1949_v41 = vrot.slane %v1947_v29, 5  ;;  %v1963_v45 = vrot.slane %v1961_v32, 5  ;;  %v3837_v28 = vld [vmem:[%s4841_s1 + $0x230] sm:$0xff]  }
  0x7a   : > { %3523 = vmatpush3.bf16.msra.mxu0 %v3793_v60  ;;  %3428 = vmatprep.subr.bf16.mxu1 %v3795_v4  ;;  %v758_v56 = vsel %vm4270_vm2, %v753_v47, %v757_v30  ;;  %v781_v60 = vrot.slane %v780_v52, 4  ;;  %v800_v3 = vsel %vm4270_vm2, %v795_v0, %v799_v54  ;;  %v1952_v30 = vshrl.u32 %v3092_v25, 16  ;;  %v3829_v47 = vld [vmem:[%s4841_s1 + $0x218] sm:$0xff]  }
  0x7b   : > { %3524 = vmatprep.subr.bf16.mxu0 %v3796_v6  ;;  %v2892_v63 = vcombine.low %v758_v56, %v772_v59  ;;  %v1944_v40 = vor.u32 %v1943_v35, %v1940_v34  ;;  %v1983_v56 = vshll.u32 %v3096_v46, 16  ;;  %v3832_v59 = vld [vmem:[%s4845_s2 + $0x20] sm:$0xff]   ;;  %v1997_v0 = vshll.u32 %v3098_v57, 16  ;;  %v3840_v34 = vld [vmem:[%s4845_s2 + $0x38] sm:$0xff]  }
  0x7c   : > { %v786_v2 = vsel %vm4270_vm2, %v781_v60, %v785_v48 }
  0x7d   : > { %3429 = vmatpush3.bf16.msra.mxu1 %v3795_v4  ;;  %v3817_v4 = vld [vmem:[%s4199_s18 + $0x90] ss:$8 sps:$4 sm:$0xff]   ;;  %v1945_v48 = vrot.slane %v1944_v40, 4 }
  0x7e   : > { %3525 = vmatpush3.bf16.msra.mxu0 %v3796_v6  ;;  %3438 = vmatprep.subr.bf16.mxu1 %v3797_v7  ;;  %v2893_v6 = vcombine.low %v786_v2, %v800_v3 }
  0x7f   : > { %3534 = vmatprep.subr.bf16.mxu0 %v3799_v10  ;;  %v1950_v52 = vsel %vm4270_vm2, %v1945_v48, %v1949_v41  ;;  %v3105_v48 = vld [vmem:[%s4199_s18 + $0x44] sm:$0x1] }
  0x80   : > { %3431 = vmatmul.mubr.bf16.vlgmr.msra.gmra.mrb[0].mxu1 %v2891_v13  ;;  %v3816_v13 = vld [vmem:[%s4841_s1 + $0x1f8] sm:$0xff]  }
  0x81   : > { %3439 = vmatpush3.bf16.msra.mxu1 %v3797_v7  ;;  %3527 = vmatmul.mubr.bf16.vlgmr.msra.gmra.mrb[0].mxu0 %v3800_v11  ;;  %v3819_v7 = vld [vmem:[%s4199_s18 + $0x50] ss:$8 sps:$4 sm:$0xff]  }
  0x82   : > { %3535 = vmatpush3.bf16.msra.mxu0 %v3799_v10  ;;  %3440 = vmatprep.subr.bf16.mxu1 %v3801_v14  ;;  %v3811_v10 = vld [vmem:[%s4841_s1 + $0xf0] sm:$0xff]  }
  0x83   : > { %3536 = vmatprep.subr.bf16.mxu0 %v3802_v18  ;;  %3530 = vmatprep.mubr.bf16.mxu0 %v3812_v55  ;;  %v3813_v11 = vld [vmem:[%s4841_s1 + $0x1f0] sm:$0xff]   ;;  %v1980_v55 = vshrl.u32 %v3096_v46, 16 }
  0x84   : > { %3434 = vmatprep.mubr.bf16.mxu1 %v2892_v63  ;;  %v1994_v63 = vshrl.u32 %v3098_v57, 16 }
  0x85   : > { %3441 = vmatpush3.bf16.msra.mxu1 %v3801_v14  ;;  %v3818_v14 = vld [vmem:[%s4199_s18 + $0xa0] ss:$8 sps:$4 sm:$0xff]  }
  0x86   : > { %3537 = vmatpush3.bf16.msra.mxu0 %v3802_v18  ;;  %3442 = vmatprep.subr.bf16.mxu1 %v3803_v37  ;;  %v3823_v18 = vld [vmem:[%s4841_s1 + $0x208] sm:$0xff]  }
  0x87   : > { %3538 = vmatprep.subr.bf16.mxu0 %v3804_v42 }
  0x88   : > { %3435 = vmatmul.mubr.bf16.gmra.mrb[4].mxu1 %v2893_v6 }
  0x89   : > { %3443 = vmatpush3.bf16.msra.mxu1 %v3803_v37  ;;  %3531 = vmatmul.mubr.bf16.gmra.mrb[4].mxu0 %v3814_v61  ;;  %v1954_v37 = vrot.slane %v1952_v30, 4  ;;  %v3100_v61 = vld [vmem:[%s4199_s18 + $0x30] sm:$0xf] }
  0x8a   : > { %3539 = vmatpush3.bf16.msra.mxu0 %v3804_v42  ;;  %3444 = vmatprep.subr.bf16.mxu1 %v3805_v58  ;;  %v3094_v42 = vld [vmem:[%s4199_s18 + $0x18] sm:$0xf]  ;;  %v2008_v2 = vshrl.u32 %v3100_v61, 16  ;;  %v2011_v3 = vshll.u32 %v3100_v61, 16 }
  0x8b   : > { %3540 = vmatprep.subr.bf16.mxu0 %v3806_v62  ;;  %3454 = vmatprep.mubr.bf16.mxu1 %v3817_v4  ;;  %v1958_v44 = vor.u32 %v1957_v38, %v1954_v37  ;;  %v1966_v51 = vshrl.u32 %v3094_v42, 16  ;;  %v1969_v54 = vshll.u32 %v3094_v42, 16  ;;  %v3833_v4 = vld [vmem:[%s4841_s1 + $0x228] sm:$0xff]  }
  0x8c   : > { %3550 = vmatprep.mubr.bf16.mxu0 %v3819_v7 }
  0x8d   : > { %3445 = vmatpush3.bf16.msra.mxu1 %v3805_v58  ;;  %v1959_v50 = vrot.slane %v1958_v44, 4  ;;  %v3831_v58 = vld [vmem:[%s4841_s1 + $0x220] sm:$0xff]   ;;  %v1968_v6 = vrot.slane %v1966_v51, 4  ;;  %v1971_v7 = vrot.slane %v1969_v54, 5 }
  0x8e   : > { %3541 = vmatpush3.bf16.msra.mxu0 %v3806_v62  ;;  %3446 = vmatprep.subr.bf16.mxu1 %v3807_v1 }
  0x8f   : > { %3542 = vmatprep.subr.bf16.mxu0 %v3808_v5  ;;  %v1964_v60 = vsel %vm4270_vm2, %v1959_v50, %v1963_v45 }
  0x90   : > { %v3122_v62 = vcombine.low %v1950_v52, %v1964_v60  ;;  %v3843_v60 = vld [vmem:[%s4199_s18 + $0xf8] ss:$8 sps:$4 sm:$0xff]  }
  0x91   : > { %3447 = vmatpush3.bf16.msra.mxu1 %v3807_v1  ;;  %v3834_v1 = vld [vmem:[%s4845_s2 + $0x28] sm:$0xff]  }
  0x92   : > { %3543 = vmatpush3.bf16.msra.mxu0 %v3808_v5  ;;  %3448 = vmatprep.subr.bf16.mxu1 %v3809_v8  ;;  %v3095_v5 = vld [vmem:[%s4199_s18 + $0x1c] sm:$0x1] }
  0x93   : > { %3544 = vmatprep.subr.bf16.mxu0 %v3810_v9 }
  0x95   : > { %3449 = vmatpush3.bf16.msra.mxu1 %v3809_v8  ;;  %v1982_v8 = vrot.slane %v1980_v55, 4  ;;  %v2045_v55 = vshll.u32 %v3105_v48, 16 }
  0x96   : > { %3545 = vmatpush3.bf16.msra.mxu0 %v3810_v9  ;;  %3450 = vmatprep.subr.bf16.mxu1 %v3811_v10  ;;  %v1985_v9 = vrot.slane %v1983_v56, 5 }
  0x97   : > { %3546 = vmatprep.subr.bf16.mxu0 %v3813_v11 }
  0x99   : > { %3451 = vmatpush3.bf16.msra.mxu1 %v3811_v10  ;;  %v3097_v10 = vld [vmem:[%s4199_s18 + $0x24] sm:$0x1] }
  0x9a   : > { %3547 = vmatpush3.bf16.msra.mxu0 %v3813_v11  ;;  %3452 = vmatprep.subr.bf16.mxu1 %v3815_v12  ;;  %v3099_v11 = vld [vmem:[%s4199_s18 + $0x2c] sm:$0x1] }
  0x9b   : > { %3548 = vmatprep.subr.bf16.mxu0 %v3816_v13  ;;  %v2003_v30 = vshll.u32 %v3099_v11, 16 }
  0x9d   : > { %3453 = vmatpush3.bf16.msra.mxu1 %v3815_v12  ;;  %v1996_v12 = vrot.slane %v1994_v63, 4  ;;  %v2005_v45 = vrot.slane %v2003_v30, 5 }
  0x9e   : > { %3549 = vmatpush3.bf16.msra.mxu0 %v3816_v13  ;;  %3582 = vmatprep.subr.bf16.mxu1 %v3821_v15  ;;  %v1999_v13 = vrot.slane %v1997_v0, 5 }
  0x9f   : > { %3558 = vmatprep.subr.bf16.mxu0 %v3820_v16 }
  0xa0   : > { %3455 = vmatmul.mubr.bf16.vlgmr.msra.gmra.mrb[0].mxu1 %v3818_v14  ;;  %v2010_v14 = vrot.slane %v2008_v2, 4  ;;  %v2000_v29 = vor.u32 %v1999_v13, %v1996_v12 }
  0xa1   : > { %3551 = vmatmul.mubr.bf16.vlgmr.msra.gmra.mrb[0].mxu0 %v3822_v17  ;;  %3583 = vmatpush3.bf16.msra.mxu1 %v3821_v15  ;;  %v2013_v15 = vrot.slane %v2011_v3, 5  ;;  %v3104_v17 = vld [vmem:[%s4199_s18 + $0x40] sm:$0xf] }
  0xa2   : > { %3559 = vmatpush3.bf16.msra.mxu0 %v3820_v16  ;;  %3584 = vmatprep.subr.bf16.mxu1 %v3824_v19  ;;  %v3102_v16 = vld [vmem:[%s4199_s18 + $0x38] sm:$0xf]  ;;  %v2036_v26 = vshrl.u32 %v3104_v17, 16  ;;  %v2039_v27 = vshll.u32 %v3104_v17, 16  ;;  %v2001_v44 = vrot.slane %v2000_v29, 4 }
  0xa3   : > { %3560 = vmatprep.subr.bf16.mxu0 %v3823_v18  ;;  %3458 = vmatprep.mubr.bf16.mxu1 %v3825_v20  ;;  %v1975_v20 = vshll.u32 %v3095_v5, 16  ;;  %v2022_v24 = vshrl.u32 %v3102_v16, 16  ;;  %v2025_v25 = vshll.u32 %v3102_v16, 16  ;;  %v2014_v31 = vor.u32 %v2013_v15, %v2010_v14 }
  0xa4   : > { %3554 = vmatprep.mubr.bf16.mxu0 %v3835_v22  ;;  %v1989_v22 = vshll.u32 %v3097_v10, 16  ;;  %v2038_v42 = vrot.slane %v2036_v26, 4  ;;  %v2006_v56 = vsel %vm4270_vm2, %v2001_v44, %v2005_v45 }
  0xa5   : > { %3585 = vmatpush3.bf16.msra.mxu1 %v3824_v19  ;;  %v1972_v19 = vor.u32 %v1971_v7, %v1968_v6  ;;  %v2024_v40 = vrot.slane %v2022_v24, 4  ;;  %v2027_v41 = vrot.slane %v2025_v25, 5  ;;  %v2015_v46 = vrot.slane %v2014_v31, 4 }
  0xa6   : > { %3561 = vmatpush3.bf16.msra.mxu0 %v3823_v18  ;;  %3586 = vmatprep.subr.bf16.mxu1 %v3828_v21  ;;  %v3101_v18 = vld [vmem:[%s4199_s18 + $0x34] sm:$0x1]  ;;  %v1991_v38 = vrot.slane %v1989_v22, 5 }
  0xa7   : > { %3562 = vmatprep.subr.bf16.mxu0 %v3827_v33  ;;  %v2017_v32 = vshll.u32 %v3101_v18, 16  ;;  %v1973_v35 = vrot.slane %v1972_v19, 4  ;;  %v2028_v52 = vor.u32 %v2027_v41, %v2024_v40 }
  0xa8   : > { %3459 = vmatmul.mubr.bf16.gmra.mrb[4].mxu1 %v3826_v36  ;;  %v1977_v36 = vrot.slane %v1975_v20, 5 }
  0xa9   : > { %3587 = vmatpush3.bf16.msra.mxu1 %v3828_v21  ;;  %3555 = vmatmul.mubr.bf16.gmra.mrb[4].mxu0 %v3836_v39  ;;  %v1986_v21 = vor.u32 %v1985_v9, %v1982_v8  ;;  %v3103_v39 = vld [vmem:[%s4199_s18 + $0x3c] sm:$0x1]  ;;  %v2029_v63 = vrot.slane %v2028_v52, 4 }
  0xaa   : > { %3563 = vmatpush3.bf16.msra.mxu0 %v3827_v33  ;;  %3588 = vmatprep.subr.bf16.mxu1 %v3830_v43  ;;  %v3839_v33 = vld [vmem:[%s4841_s1 + $0x238] sm:$0xff]   ;;  %v2031_v50 = vshll.u32 %v3103_v39, 16 }
  0xab   : > { %3564 = vmatprep.subr.bf16.mxu0 %v3829_v47  ;;  %3598 = vmatprep.mubr.bf16.mxu1 %v3841_v49  ;;  %v1987_v37 = vrot.slane %v1986_v21, 4  ;;  %v1978_v49 = vsel %vm4270_vm2, %v1973_v35, %v1977_v36 }
  0xac   : > { %3574 = vmatprep.mubr.bf16.mxu0 %v3122_v62  ;;  %v2033_v61 = vrot.slane %v2031_v50, 5 }
  0xad   : > { %3589 = vmatpush3.bf16.msra.mxu1 %v3830_v43  ;;  %v2041_v43 = vrot.slane %v2039_v27, 5  ;;  %v1992_v51 = vsel %vm4270_vm2, %v1987_v37, %v1991_v38 }
  0xae   : > { %3565 = vmatpush3.bf16.msra.mxu0 %v3829_v47  ;;  %3590 = vmatprep.subr.bf16.mxu1 %v3832_v59  ;;  %v2019_v47 = vrot.slane %v2017_v32, 5  ;;  %v2034_v2 = vsel %vm4270_vm2, %v2029_v63, %v2033_v61 }
  0xaf   : > { %3566 = vmatprep.subr.bf16.mxu0 %v3831_v58  ;;  %v2042_v54 = vor.u32 %v2041_v43, %v2038_v42 }
  0xb0   : > { %v2020_v57 = vsel %vm4270_vm2, %v2015_v46, %v2019_v47 }
  0xb1   : > { %3591 = vmatpush3.bf16.msra.mxu1 %v3832_v59  ;;  %v3123_v59 = vcombine.low %v1978_v49, %v1992_v51  ;;  %v3124_v62 = vcombine.low %v2006_v56, %v2020_v57  ;;  %v2043_v0 = vrot.slane %v2042_v54, 4 }
  0xb2   : > { %3567 = vmatpush3.bf16.msra.mxu0 %v3831_v58  ;;  %3592 = vmatprep.subr.bf16.mxu1 %v3834_v1  ;;  %v3842_v58 = vld [vmem:[%s4199_s18 + $0xe8] ss:$8 sps:$4 sm:$0xff]  }
  0xb3   : > { %3568 = vmatprep.subr.bf16.mxu0 %v3833_v4 }
  0xb5   : > { %3593 = vmatpush3.bf16.msra.mxu1 %v3834_v1  ;;  %v2047_v1 = vrot.slane %v2045_v55, 5 }
  0xb6   : > { %3569 = vmatpush3.bf16.msra.mxu0 %v3833_v4  ;;  %3594 = vmatprep.subr.bf16.mxu1 %v3838_v23  ;;  %v3844_v4 = vld [vmem:[%s4199_s18 + $0x108] ss:$8 sps:$4 sm:$0xff]   ;;  %s4547_s18 = scalar_lea.vmem [#allocation7], %s2823_s12 }
  0xb7   : > { %3570 = vmatprep.subr.bf16.mxu0 %v3837_v28  ;;  %v2048_v3 = vsel %vm4270_vm2, %v2043_v0, %v2047_v1  ;;  %s2593_s17 = sshll.u32 %s4547_s18, 4  ;;  %s4565_s17 = int_to_ptr.vmem [resolvable:$true] %s2593_s17 }
  0xb8   : > { %v3125_v5 = vcombine.low %v2034_v2, %v2048_v3  ;;  %s3845_s23 = scalar_lea.vmem %s4565_s17, 512 }
  0xb9   : > { %3595 = vmatpush3.bf16.msra.mxu1 %v3838_v23  ;;  %p3846_p11 = scmp.ne.s32.totalorder %s4565_s17, %s3845_s23 }
  0xba   : > { %3571 = vmatpush3.bf16.msra.mxu0 %v3837_v28  ;;  %3596 = vmatprep.subr.bf16.mxu1 %v3840_v34 }
  0xbb   : > { %3572 = vmatprep.subr.bf16.mxu0 %v3839_v33  ;;  %p3847_p12 = pnand %p3846_p11, %p4154_p5 }
  0xbd   : > { %3597 = vmatpush3.bf16.msra.mxu1 %v3840_v34  ;;  %p3848_p13 = pneg %p3847_p12 }
  0xbe   : > { %3573 = vmatpush3.bf16.msra.mxu0 %v3839_v33 }
  0xc0   : > { %3599 = vmatmul.mubr.bf16.vlgmr.msra.gmra.mrb[8].mxu1 %v3842_v58 }
  0xc1   : > { %3575 = vmatmul.mubr.bf16.vlgmr.msra.gmra.mrb[0].mxu0 %v3123_v59  ;;  %3602 = vmatprep.mubr.bf16.mxu1 %v3843_v60 }
  0xc2   : > { %3578 = vmatprep.mubr.bf16.mxu0 %v3124_v62 }
  0xc8   : > { %3603 = vmatmul.mubr.bf16.gmra.mrb[12].mxu1 %v3844_v4 }
  0xc9   : > { %3579 = vmatmul.mubr.bf16.gmra.mrb[4].mxu0 %v3125_v5 }
 0x173   : > { %v3456_v6 = vpop.f32.mrb[0].mxu1 }
 0x174   : > { %v1087_v7 = vpop.f32.mrb[1].mxu1 }
 0x175   : > { %v3457_v8 = vpop.f32.mrb[2].mxu1 }
 0x176   : > { %v1090_v9 = vpop.f32.mrb[3].mxu1 }
 0x17b   : > { %v3460_v10 = vpop.f32.mrb[4].mxu1 }
 0x17c   : > { %v1103_v11 = vpop.f32.mrb[5].mxu1 }
 0x17d   : > { %v3461_v12 = vpop.f32.mrb[6].mxu1 }
 0x17e   : > { %v4541_v13 = vpop.f32.mrb[7].mxu1 }
 0x193   : > { %v3600_v14 = vpop.f32.mrb[8].mxu1 }
 0x194   : > { %v3576_v53 = vpop.f32.mrb[0].mxu0  ;;  %v2409_v15 = vpop.f32.mrb[9].mxu1  ;;  %v2496_v30 = vmul.f32 %v3600_v14, %v3600_v14 }
 0x195   : > { %v3606_v16 = vadd.f32 %v3576_v53, %v3456_v6  ;;  %v2164_v17 = vpop.f32.mrb[1].mxu0  ;;  %v3601_v18 = vpop.f32.mrb[10].mxu1  ;;  %v2494_v20 = vmul.f32 %v2409_v15, %v2409_v15 }
 0x196   : > { %v3607_v19 = vadd.f32 %v2164_v17, %v1087_v7  ;;  %v3577_v21 = vpop.f32.mrb[2].mxu0  ;;  %v3228_v22 = vpack.c.bf16 %v3601_v18, %v3600_v14  ;;  %v2412_v23 = vpop.f32.mrb[11].mxu1  ;;  %v2497_v38 = vmul.f32 %v3601_v18, %v3601_v18 }
 0x197   : > { %v3608_v24 = vadd.f32 %v3577_v21, %v3457_v8  ;;  %v2167_v25 = vpop.f32.mrb[3].mxu0  ;;  %v3223_v26 = vpack.c.bf16 %v2412_v23, %v2409_v15  ;;  %v2480_v27 = vadd.f32 %v2412_v23, %v2409_v15  ;;  %v2495_v29 = vmul.f32 %v2412_v23, %v2412_v23 }
 0x198   : > { %3243 = vst [vmem:[%s4547_s18 + $0x8] sm:$0xff] %v3228_v22   ;;  %v3609_v28 = vadd.f32 %v2167_v25, %v1090_v9  ;;  %v2257_v31 = vmul.f32 %v3607_v19, %v3607_v19  ;;  %v2259_v41 = vmul.f32 %v3606_v16, %v3606_v16 }
 0x199   : > { %v3208_v32 = vpack.c.bf16 %v3608_v24, %v3606_v16  ;;  %3224 = vst [vmem:[%s4547_s18] sm:$0xff] %v3223_v26   ;;  %v2481_v33 = vadd.f32 %v3600_v14, %v2480_v27  ;;  %v2502_v37 = vadd.f32 %v2495_v29, %v2494_v20  ;;  %v2260_v47 = vmul.f32 %v3608_v24, %v3608_v24 }
 0x19a   : > { %v3203_v34 = vpack.c.bf16 %v3609_v28, %v3607_v19  ;;  %v2243_v35 = vadd.f32 %v3609_v28, %v3607_v19  ;;  %v2258_v36 = vmul.f32 %v3609_v28, %v3609_v28 }
 0x19b   : > { %3240 = vst [vmem:[%s4551_s13 + $0x8] sm:$0xff] %v3208_v32   ;;  %v3604_v39 = vpop.f32.mrb[12].mxu1  ;;  %v2482_v40 = vadd.f32 %v3601_v18, %v2481_v33  ;;  %v2503_v44 = vadd.f32 %v2502_v37, %v2496_v30 }
 0x19c   : > { %3204 = vst [vmem:[%s4551_s13] sm:$0xff] %v3203_v34   ;;  %v2244_v42 = vadd.f32 %v3606_v16, %v2243_v35  ;;  %v2265_v43 = vadd.f32 %v2258_v36, %v2257_v31  ;;  %v3580_v45 = vpop.f32.mrb[4].mxu0  ;;  %v2425_v46 = vpop.f32.mrb[13].mxu1 }
 0x19d   : > { %v4556_v48 = vadd.f32 %v3580_v45, %v3460_v10  ;;  %v2180_v49 = vpop.f32.mrb[5].mxu0  ;;  %v2483_v50 = vadd.f32 %v2482_v40, %v2425_v46  ;;  %v2498_v51 = vmul.f32 %v2425_v46, %v2425_v46  ;;  %v4558_v52 = vpop.f32.mrb[14].mxu1  ;;  %v2504_v57 = vadd.f32 %v2503_v44, %v2497_v38 }
 0x19e   : > { %v2266_v54 = vadd.f32 %v2265_v43, %v2259_v41  ;;  %v4561_v55 = vadd.f32 %v2180_v49, %v1103_v11  ;;  %v2245_v56 = vadd.f32 %v3608_v24, %v2244_v42  ;;  %v3581_v58 = vpop.f32.mrb[6].mxu0  ;;  %v2428_v59 = vpop.f32.mrb[15].mxu1  ;;  %v3238_v61 = vpack.c.bf16 %v4558_v52, %v3604_v39 }
 0x19f   : > { %v4567_v60 = vadd.f32 %v3581_v58, %v3461_v12  ;;  %v2183_v62 = vpop.f32.mrb[7].mxu0  ;;  %v2505_v2 = vadd.f32 %v2504_v57, %v2498_v51  ;;  %v3233_v5 = vpack.c.bf16 %v2428_v59, %v2425_v46  ;;  %v2484_v7 = vadd.f32 %v2483_v50, %v2428_v59 }
 0x1a0   : > { %v2246_v63 = vadd.f32 %v4561_v55, %v2245_v56  ;;  %v2261_v0 = vmul.f32 %v4561_v55, %v4561_v55  ;;  %v2267_v1 = vadd.f32 %v2266_v54, %v2260_v47  ;;  %3245 = vst [vmem:[%s4547_s18 + $0x18] sm:$0xff] %v3238_v61   ;;  %v3613_v4 = vadd.f32 %v2183_v62, %v4541_v13 }
 0x1a1   : > { %v3218_v3 = vpack.c.bf16 %v4567_v60, %v4556_v48  ;;  %v2499_v8 = vmul.f32 %v2428_v59, %v2428_v59  ;;  %3244 = vst [vmem:[%s4547_s18 + $0x10] sm:$0xff] %v3233_v5   ;;  %v2500_v12 = vmul.f32 %v3604_v39, %v3604_v39  ;;  %v2485_v13 = vadd.f32 %v3604_v39, %v2484_v7  ;;  %s3849_s18 = sshll.u32 %s4061_s0, 4  ;;  %s3850_s18 = int_to_ptr.vmem [resolvable:$false] %s3849_s18 }
 0x1a2   : > { %v2268_v6 = vadd.f32 %v2267_v1, %v2261_v0  ;;  %v3213_v9 = vpack.c.bf16 %v3613_v4, %v4561_v55  ;;  %v2247_v10 = vadd.f32 %v3613_v4, %v2246_v63  ;;  %v2262_v11 = vmul.f32 %v3613_v4, %v3613_v4  ;;  %s3851_s1 = scalar_lea.vmem %s3850_s18, 1024  ;;  %p3852_p0 = scmp.lt.s32.totalorder %s4565_s17, %s3850_s18 }
 0x1a3   : > { %3242 = vst [vmem:[%s4551_s13 + $0x18] sm:$0xff] %v3218_v3   ;;  %v2506_v14 = vadd.f32 %v2505_v2, %v2499_v8  ;;  %p3853_p1 = scmp.lt.s32.totalorder %s3851_s1, %s3845_s23 }
 0x1a5   : > { %p3854_p2 = por %p3853_p1, %p3852_p0 }
 0x1a7   : > { %p3855_p3 = pnand %p3854_p2, %p3848_p13 }
 0x1a9   : > { %3858 = shalt.err (!%p3855_p3)
}
 0x1aa   : > { %s3859_s20 = scalar_lea.hbm %s4580_s24, 512  ;;  %s3863_s0 = scalar_lea.hbm %s4846_s6, 1024 }
 0x1ab   : > { %p3860_p4 = scmp.ne.s32.totalorder %s4580_s24, %s3859_s20  ;;  %p3864_p9 = scmp.lt.u32.totalorder %s4580_s24, %s4846_s6 }
 0x1ac   : > { %p3865_p10 = scmp.lt.u32.totalorder %s3863_s0, %s3859_s20  ;;  %p3867_p12 = scmp.lt.u32.totalorder %s3859_s20, %s4580_s24 }
 0x1ad   : > { %p3861_p7 = pnand %p3860_p4, %p4154_p5 }
 0x1ae   : > { %p3866_p11 = por %p3865_p10, %p3864_p9 }
 0x1af   : > { %p3862_p8 = pneg %p3861_p7 }
 0x1b0   : > { %p3868_p13 = por %p3867_p12, %p3866_p11 }
 0x1b2   : > { %p3869_p0 = pnand %p3868_p13, %p3862_p8 }
 0x1b4   : > { %3872 = shalt.err (!%p3869_p0)
}
 0x1b5   : > { %s4062_s1 = smov 64   ;;  %s4063_s23 = smov 4   ;;  %v2263_v53 = vmul.f32 %v4556_v48, %v4556_v48  ;;  %3241 = vst [vmem:[%s4551_s13 + $0x10] sm:$0xff] %v3213_v9   ;;  %v2248_v15 = vadd.f32 %v4556_v48, %v2247_v10  ;;  %v2269_v16 = vadd.f32 %v2268_v6, %v2262_v11  ;;  %v2501_v17 = vmul.f32 %v4558_v52, %v4558_v52 }
 0x1b6   : > { %3674 = dma.vmem_to_hbm [thread:$0]  (%p4154_p5), %s4565_s17, 512, %s4580_s24, %s4594_s22, %s4062_s1, %s4062_s1, %s4063_s23   ;;  %v2486_v18 = vadd.f32 %v4558_v52, %v2485_v13  ;;  %v2507_v19 = vadd.f32 %v2506_v14, %v2500_v12 }
 0x1b7   : > { %s2517_s19 = scalar_lea.sflag [#allocation3], %s4544_s26  ;;  %s3873_s20 = scalar_lea.vmem %s4590_s21, 512 }
 0x1b8   : > { %p3874_p1 = scmp.ne.s32.totalorder %s4590_s21, %s3873_s20  ;;  %s4064_s17 = smov [#allocation2]  }
 0x1b9   : > { %s3877_s24 = sshll.u32 %s4064_s17, 4  ;;  %s3878_s24 = int_to_ptr.vmem [resolvable:$false] %s3877_s24 }
 0x1ba   : > { %p3875_p2 = pnand %p3874_p1, %p4154_p5  ;;  %s3879_s25 = scalar_lea.vmem %s3878_s24, 1024 }
 0x1bb   : > { %p3880_p4 = scmp.lt.s32.totalorder %s4590_s21, %s3878_s24  ;;  %p3881_p7 = scmp.lt.s32.totalorder %s3879_s25, %s3873_s20 }
 0x1bc   : > { %p3876_p3 = pneg %p3875_p2 }
 0x1bd   : > { %p3882_p8 = por %p3881_p7, %p3880_p4 }
 0x1bf   : > { %p3883_p9 = pnand %p3882_p8, %p3876_p3 }
 0x1c1   : > { %3886 = shalt.err (!%p3883_p9)
}
 0x1c2   : > { %s3887_s13 = scalar_lea.hbm %s4588_s10, 512  ;;  %s3891_s18 = scalar_lea.hbm %s4847_s3, 1024 }
 0x1c3   : > { %p3888_p10 = scmp.ne.s32.totalorder %s4588_s10, %s3887_s13  ;;  %p3892_p13 = scmp.lt.u32.totalorder %s4588_s10, %s4847_s3 }
 0x1c4   : > { %p3893_p0 = scmp.lt.u32.totalorder %s3891_s18, %s3887_s13  ;;  %p3895_p2 = scmp.lt.u32.totalorder %s3887_s13, %s4588_s10 }
 0x1c5   : > { %p3889_p11 = pnand %p3888_p10, %p4154_p5 }
 0x1c6   : > { %p3894_p1 = por %p3893_p0, %p3892_p13 }
 0x1c7   : > { %p3890_p12 = pneg %p3889_p11 }
 0x1c8   : > { %p3896_p3 = por %p3895_p2, %p3894_p1 }
 0x1ca   : > { %p3897_p4 = pnand %p3896_p3, %p3890_p12 }
 0x1cc   : > { %3900 = shalt.err (!%p3897_p4)
}
 0x1cd   : > { %3671 = dma.vmem_to_hbm [thread:$0]  (%p4154_p5), %s4590_s21, 512, %s4588_s10, %s2517_s19, %s4062_s1, %s4062_s1, %s4063_s23   ;;  %v2264_v20 = vmul.f32 %v4567_v60, %v4567_v60  ;;  %v2249_v21 = vadd.f32 %v4567_v60, %v2248_v15  ;;  %v2270_v22 = vadd.f32 %v2269_v16, %v2263_v53  ;;  %v2487_v23 = vrot.slane %v2486_v18, 4 }
 0x1ce   : > { %v2508_v24 = vadd.f32 %v2507_v19, %v2501_v17  ;;  %s4659_s10 = sshll.u32 %s4135_s9, 4  ;;  %s4831_s21 = scalar_lea.vmem [#allocation4], %s4544_s26 }
 0x1cf   : > { %v2250_v25 = vrot.slane %v2249_v21, 4  ;;  %v2271_v26 = vadd.f32 %v2270_v22, %v2264_v20  ;;  %v2488_v27 = vadd.f32 %v2487_v23, %v2486_v18  ;;  %s2567_s1 = sshll.u32 %s4831_s21, 4  ;;  %s4668_s20 = scalar_lea.hbm %s4824_s4, %s4659_s10  ;;  %s4671_s1 = int_to_ptr.vmem [resolvable:$true] %s2567_s1 }
 0x1d0   : > { %v2509_v28 = vrot.slane %v2508_v24, 4  ;;  %s333_s25 = scalar_lea.vmem [#allocation9], %s4544_s26  ;;  %s4832_s12 = scalar_lea.vmem [#allocation6], %s4544_s26 }
 0x1d1   : > { %v2272_v29 = vrot.slane %v2271_v26, 4  ;;  %v2251_v30 = vadd.f32 %v2250_v25, %v2249_v21  ;;  %v2489_v31 = vrot.slane %v2488_v27, 2  ;;  %s2609_s13 = sshll.u32 %s333_s25, 4  ;;  %s2580_s0 = sshll.u32 %s4832_s12, 4  ;;  %s4691_s13 = int_to_ptr.vmem [resolvable:$true] %s2609_s13  ;;  %s4693_s0 = int_to_ptr.vmem [resolvable:$true] %s2580_s0 }
 0x1d2   : > { %v2510_v32 = vadd.f32 %v2509_v28, %v2508_v24  ;;  %s4680_s24 = scalar_lea.hbm %s4825_s5, %s4659_s10  ;;  %s4833_s23 = scalar_lea.vmem [#allocation10], %s4544_s26 }
 0x1d3   : > { %v2252_v33 = vrot.slane %v2251_v30, 2  ;;  %v2273_v34 = vadd.f32 %v2272_v29, %v2271_v26  ;;  %v2490_v35 = vadd.f32 %v2489_v31, %v2488_v27  ;;  %s2622_s19 = sshll.u32 %s4833_s23, 4  ;;  %s4689_s12 = scalar_lea.hbm %s4827_s7, %s4659_s10  ;;  %s4701_s19 = int_to_ptr.vmem [resolvable:$true] %s2622_s19 }
 0x1d4   : > { %v2511_v36 = vrot.slane %v2510_v32, 2  ;;  %s4699_s23 = scalar_lea.hbm %s4828_s8, %s4659_s10  ;;  %s4848_s2 = scalar_lea.vmem [#allocation4], %s4544_s26 }
 0x1d5   : > { %v2253_v37 = vadd.f32 %v2252_v33, %v2251_v30  ;;  %v2274_v38 = vrot.slane %v2273_v34, 2  ;;  %v2491_v39 = vrot.slane %v2490_v35, 1  ;;  %s3901_s21 = scalar_lea.vmem %s4691_s13, 16  ;;  %s4065_s3 = smov [#allocation9]  }
 0x1d6   : > { %v2512_v40 = vadd.f32 %v2511_v36, %v2510_v32  ;;  %p3902_p7 = scmp.ne.s32.totalorder %s4691_s13, %s3901_s21  ;;  %s3905_s6 = sshll.u32 %s4065_s3, 4  ;;  %s3906_s6 = int_to_ptr.vmem [resolvable:$false] %s3905_s6 }
 0x1d7   : > { %v2254_v41 = vrot.slane %v2253_v37, 1  ;;  %v2275_v42 = vadd.f32 %v2274_v38, %v2273_v34  ;;  %v2492_v43 = vadd.f32 %v2491_v39, %v2490_v35  ;;  %p3908_p10 = scmp.lt.s32.totalorder %s4691_s13, %s3906_s6 }
 0x1d8   : > { %v2513_v44 = vrot.slane %v2512_v40, 1  ;;  %p3903_p8 = pnand %p3902_p7, %p4154_p5 }
 0x1d9   : > { %v2255_v45 = vadd.f32 %v2254_v41, %v2253_v37  ;;  %v2276_v46 = vrot.slane %v2275_v42, 1  ;;  %2493 = vst [vmem:[%s333_s25] sm:$0x1] %v2492_v43  ;;  %s3907_s25 = scalar_lea.vmem %s3906_s6, 32 }
 0x1da   : > { %v2514_v47 = vadd.f32 %v2513_v44, %v2512_v40  ;;  %p3904_p9 = pneg %p3903_p8  ;;  %p3909_p11 = scmp.lt.s32.totalorder %s3907_s25, %s3901_s21 }
 0x1db   : > { %2256 = vst [vmem:[%s4848_s2] sm:$0x1] %v2255_v45  ;;  %v2277_v48 = vadd.f32 %v2276_v46, %v2275_v42 }
 0x1dc   : > { %p3910_p12 = por %p3909_p11, %p3908_p10 }
 0x1de   : > { %p3911_p13 = pnand %p3910_p12, %p3904_p9 }
 0x1e0   : > { %3914 = shalt.err (!%p3911_p13)
}
 0x1e1   : > { %s3915_s10 = scalar_lea.hbm %s4689_s12, 16  ;;  %s3919_s3 = scalar_lea.hbm %s4827_s7, 32 }
 0x1e2   : > { %p3916_p0 = scmp.ne.s32.totalorder %s4689_s12, %s3915_s10  ;;  %p3920_p3 = scmp.lt.u32.totalorder %s4689_s12, %s4827_s7 }
 0x1e3   : > { %p3921_p4 = scmp.lt.u32.totalorder %s3919_s3, %s3915_s10  ;;  %p3923_p8 = scmp.lt.u32.totalorder %s3915_s10, %s4689_s12 }
 0x1e4   : > { %p3917_p1 = pnand %p3916_p0, %p4154_p5 }
 0x1e5   : > { %p3922_p7 = por %p3921_p4, %p3920_p3 }
 0x1e6   : > { %p3918_p2 = pneg %p3917_p1 }
 0x1e7   : > { %p3924_p9 = por %p3923_p8, %p3922_p7 }
 0x1e9   : > { %p3925_p10 = pnand %p3924_p9, %p3918_p2 }
 0x1eb   : > { %3928 = shalt.err (!%p3925_p10)
}
 0x1ec   : > { %3675 = dma.vmem_to_hbm [thread:$0]  (%p4154_p5), %s4691_s13, 16, %s4689_s12, %s4594_s22  }
 0x1ed   : > { %s4849_s21 = sand.u32 1, %s4135_s9   ;;  %s3929_s18 = scalar_lea.vmem %s4671_s1, 16 }
 0x1ee   : > { %s4729_s25 = scalar_lea.sflag [#allocation5], %s4849_s21  ;;  %p3930_p11 = scmp.ne.s32.totalorder %s4671_s1, %s3929_s18 }
 0x1ef   : > { %s4066_s10 = smov [#allocation4]  }
 0x1f0   : > { %p3931_p12 = pnand %p3930_p11, %p4154_p5  ;;  %s3933_s17 = sshll.u32 %s4066_s10, 4  ;;  %s3934_s17 = int_to_ptr.vmem [resolvable:$false] %s3933_s17 }
 0x1f1   : > { %s3935_s3 = scalar_lea.vmem %s3934_s17, 32  ;;  %p3936_p0 = scmp.lt.s32.totalorder %s4671_s1, %s3934_s17 }
 0x1f2   : > { %p3932_p13 = pneg %p3931_p12  ;;  %p3937_p1 = scmp.lt.s32.totalorder %s3935_s3, %s3929_s18 }
 0x1f4   : > { %p3938_p2 = por %p3937_p1, %p3936_p0 }
 0x1f6   : > { %p3939_p3 = pnand %p3938_p2, %p3932_p13 }
 0x1f8   : > { %3942 = shalt.err (!%p3939_p3)
}
 0x1f9   : > { %s3943_s9 = scalar_lea.hbm %s4668_s20, 16  ;;  %s3947_s12 = scalar_lea.hbm %s4824_s4, 32 }
 0x1fa   : > { %p3944_p4 = scmp.ne.s32.totalorder %s4668_s20, %s3943_s9  ;;  %p3948_p9 = scmp.lt.u32.totalorder %s4668_s20, %s4824_s4 }
 0x1fb   : > { %p3949_p10 = scmp.lt.u32.totalorder %s3947_s12, %s3943_s9  ;;  %p3951_p12 = scmp.lt.u32.totalorder %s3943_s9, %s4668_s20 }
 0x1fc   : > { %p3945_p7 = pnand %p3944_p4, %p4154_p5 }
 0x1fd   : > { %p3950_p11 = por %p3949_p10, %p3948_p9 }
 0x1fe   : > { %p3946_p8 = pneg %p3945_p7 }
 0x1ff   : > { %p3952_p13 = por %p3951_p12, %p3950_p11 }
 0x201   : > { %p3953_p0 = pnand %p3952_p13, %p3946_p8 }
 0x203   : > { %3956 = shalt.err (!%p3953_p0)
}
 0x204   : > { %3672 = dma.vmem_to_hbm [thread:$0]  (%p4154_p5), %s4671_s1, 16, %s4668_s20, %s4729_s25  }
 0x205   : > { %s4850_s21 = scalar_lea.vmem [#allocation10], %s4544_s26  ;;  %s4851_s18 = scalar_lea.vmem [#allocation6], %s4544_s26 }
 0x206   : > { %2515 = vst [vmem:[%s4850_s21] sm:$0x1] %v2514_v47  ;;  %2278 = vst [vmem:[%s4851_s18] sm:$0x1] %v2277_v48  ;;  %s2539_s10 = scalar_lea.sflag [#allocation11], %s4544_s26  ;;  %s3957_s17 = scalar_lea.vmem %s4701_s19, 16 }
 0x207   : > { %p3958_p1 = scmp.ne.s32.totalorder %s4701_s19, %s3957_s17  ;;  %s4067_s3 = smov [#allocation10]  }
 0x208   : > { %s3961_s9 = sshll.u32 %s4067_s3, 4  ;;  %s3962_s9 = int_to_ptr.vmem [resolvable:$false] %s3961_s9 }
 0x209   : > { %p3959_p2 = pnand %p3958_p1, %p4154_p5  ;;  %s3963_s22 = scalar_lea.vmem %s3962_s9, 32 }
 0x20a   : > { %p3964_p4 = scmp.lt.s32.totalorder %s4701_s19, %s3962_s9  ;;  %p3965_p7 = scmp.lt.s32.totalorder %s3963_s22, %s3957_s17 }
 0x20b   : > { %p3960_p3 = pneg %p3959_p2 }
 0x20c   : > { %p3966_p8 = por %p3965_p7, %p3964_p4 }
 0x20e   : > { %p3967_p9 = pnand %p3966_p8, %p3960_p3 }
 0x210   : > { %3970 = shalt.err (!%p3967_p9)
}
 0x211   : > { %s3971_s26 = scalar_lea.hbm %s4699_s23, 16  ;;  %s3975_s13 = scalar_lea.hbm %s4828_s8, 32 }
 0x212   : > { %p3972_p10 = scmp.ne.s32.totalorder %s4699_s23, %s3971_s26  ;;  %p3976_p13 = scmp.lt.u32.totalorder %s4699_s23, %s4828_s8 }
 0x213   : > { %p3977_p0 = scmp.lt.u32.totalorder %s3975_s13, %s3971_s26  ;;  %p3979_p2 = scmp.lt.u32.totalorder %s3971_s26, %s4699_s23 }
 0x214   : > { %p3973_p11 = pnand %p3972_p10, %p4154_p5 }
 0x215   : > { %p3978_p1 = por %p3977_p0, %p3976_p13 }
 0x216   : > { %p3974_p12 = pneg %p3973_p11 }
 0x217   : > { %p3980_p3 = por %p3979_p2, %p3978_p1 }
 0x219   : > { %p3981_p4 = pnand %p3980_p3, %p3974_p12 }
 0x21b   : > { %3984 = shalt.err (!%p3981_p4)
}
 0x21c   : > { %3676 = dma.vmem_to_hbm [thread:$0]  (%p4154_p5), %s4701_s19, 16, %s4699_s23, %s2539_s10  }
 0x21d   : > { %s3985_s6 = scalar_lea.vmem %s4693_s0, 16  ;;  %s4068_s21 = smov [#allocation6]  }
 0x21e   : > { %p3986_p7 = scmp.ne.s32.totalorder %s4693_s0, %s3985_s6  ;;  %s3989_s18 = sshll.u32 %s4068_s21, 4  ;;  %s3990_s18 = int_to_ptr.vmem [resolvable:$false] %s3989_s18 }
 0x21f   : > { %s3991_s17 = scalar_lea.vmem %s3990_s18, 32  ;;  %p3992_p10 = scmp.lt.s32.totalorder %s4693_s0, %s3990_s18 }
 0x220   : > { %p3987_p8 = pnand %p3986_p7, %p4154_p5  ;;  %p3993_p11 = scmp.lt.s32.totalorder %s3991_s17, %s3985_s6 }
 0x222   : > { %p3988_p9 = pneg %p3987_p8  ;;  %p3994_p12 = por %p3993_p11, %p3992_p10 }
 0x224   : > { %p3995_p13 = pnand %p3994_p12, %p3988_p9 }
 0x226   : > { %3998 = shalt.err (!%p3995_p13)
}
 0x227   : > { %s3999_s23 = scalar_lea.hbm %s4680_s24, 16  ;;  %s4003_s3 = scalar_lea.hbm %s4825_s5, 32 }
 0x228   : > { %p4000_p0 = scmp.ne.s32.totalorder %s4680_s24, %s3999_s23  ;;  %p4004_p3 = scmp.lt.u32.totalorder %s4680_s24, %s4825_s5 }
 0x229   : > { %p4005_p4 = scmp.lt.u32.totalorder %s4003_s3, %s3999_s23  ;;  %p4007_p8 = scmp.lt.u32.totalorder %s3999_s23, %s4680_s24 }
 0x22a   : > { %p4001_p1 = pnand %p4000_p0, %p4154_p5 }
 0x22b   : > { %p4006_p7 = por %p4005_p4, %p4004_p3 }
 0x22c   : > { %p4002_p2 = pneg %p4001_p1 }
 0x22d   : > { %p4008_p9 = por %p4007_p8, %p4006_p7 }
 0x22f   : > { %p4009_p10 = pnand %p4008_p9, %p4002_p2 }
 0x231   : > { %4012 = shalt.err (!%p4009_p10)
}
 0x232   : > { %3673 = dma.vmem_to_hbm [thread:$0]  (%p4154_p5), %s4693_s0, 16, %s4680_s24, %s4729_s25  }
 0x233 PF: > { %p3702_p11 = scmp.ge.s32.totalorder %s4059_s30, 2  ;;  %s2634_s26 = sand.u32 1, %s4047_s27  }
 0x234   : > { %s2635_s1 = scalar_lea.sflag [#allocation3], %s2634_s26 }
 0x235   : > { %p3684_p12 = pnand %p3702_p11, %p4158_p6 }
 0x237   : > { %4030 = dma.done.wait (!%p3684_p12), %s2635_s1, 512  }
 0x238   : > { %4032 = vsyncadd (!%p3684_p12), %s2635_s1, 4294966784  ;;  %s4852_s20 = sadd.s32 4294967294, %s4059_s30  }
 0x239   : > { %s2643_s13 = sand.u32 1, %s4852_s20  }
 0x23a   : > { %s2644_s12 = scalar_lea.sflag [#allocation5], %s2643_s13 }
 0x23b   : > { %4034 = dma.done.wait (!%p3684_p12), %s2644_s12, 32  }
 0x23c   : > { %4036 = vsyncadd (!%p3684_p12), %s2644_s12, 4294967264  ;;  %s2660_s15 = scalar_lea.sflag [#allocation8], %s2643_s13 }
 0x23d   : > { %4038 = dma.done.wait (!%p3684_p12), %s2660_s15, 528  }
 0x23e   : > { %4040 = vsyncadd (!%p3684_p12), %s2660_s15, 4294966768  ;;  %s2677_s0 = scalar_lea.sflag [#allocation11], %s2634_s26 }
 0x23f   : > { %4042 = dma.done.wait (!%p3684_p12), %s2677_s0, 16  }
 0x240   : > { %4044 = vsyncadd (!%p3684_p12), %s2677_s0, 4294967280  ;;  %p28_p5 = scmp.ge.s32.totalorder %s4139_s11, 4   ;;  %s4853_s27 = smov %s4051_s28 }
 0x241   : > { %s4854_s28 = smov %s4055_s29  ;;  %s4855_s29 = smov %s4152_s14 }
 0x242   : > { %s4856_s30 = smov %s4139_s11  ;;  %30 = sbr.rel (!%p28_p5) target bundleno = 15 (0xf), region = 161 }
 0x249   :  { %2681 = vsyncpa [#allocation3], 1 }
 0x24a   :  { %2683 = vsyncpa [#allocation3 + $0x1], 1 }
 0x24b   :  { %2684 = vsyncpa [#allocation5], 1 }
 0x24c   :  { %2686 = vsyncpa [#allocation5 + $0x1], 1 }
 0x24d   :  { %2687 = vsyncpa [#allocation8], 1 }
 0x24e   :  { %2689 = vsyncpa [#allocation8 + $0x1], 1 }
 0x24f   :  { %2690 = vsyncpa [#allocation11], 1 }
 0x250   :  { %2692 = vsyncpa [#allocation11 + $0x1], 1 }

</bundles_post_ra>
